<compile_context>
chip_gen: v7x
topology: tpu7x:2x2x1
jax: 0.10.0
libtpu: 0.0.40
codegen_flags: <defaults>
</compile_context>

<pallas_src>
import numpy as np
import jax
import jax.numpy as jnp
from jax import lax
from jax.experimental import pallas as pl
from jax.experimental.pallas import tpu as pltpu


# ------------------------------------------------------------------------
# Kernel 1: embedding add + trainable positional encoding + encoder add
#           (time-major: (T, B, D))
# ------------------------------------------------------------------------
def _embed_pos_kernel(emb_ref, pos_ref, enc_ref, we_ref, be_ref, wa_ref, o_ref):
    p = pos_ref[...][..., None]                     # (T, B, 1)
    we = we_ref[0][None, None, :]                   # (1, 1, Dh)
    be = be_ref[0][None, None, :]
    wa = wa_ref[0][None, None, :]
    e = jnp.exp((p * we + be) * (1.0 / 80.0))       # (T, B, Dh)
    a = p * wa
    pe = jnp.concatenate([e * jnp.sin(a), e * jnp.cos(a)], axis=-1)
    o_ref[...] = emb_ref[...] + pe + enc_ref[...][None, :, :]


def embed_pos_add(emb_x_tm, pos_tm, enc, w_exp, b_exp, w_ang):
    T, B, D = emb_x_tm.shape
    return pl.pallas_call(
        _embed_pos_kernel,
        out_shape=jax.ShapeDtypeStruct((T, B, D), jnp.float32),
    )(emb_x_tm, pos_tm, enc, w_exp, b_exp, w_ang)


# ------------------------------------------------------------------------
# Kernel 2: one fused GRU stack (all layers of a submodel, time loop inside)
#   weights packed as (Din, 3H) / (H, 3H), gate order [r | z | n]
#   pack_padded_sequence semantics via an in-kernel (t < length) mask
# ------------------------------------------------------------------------
def _make_gru_stack_kernel(num_layers, T, H):
    def kernel(*refs):
        x_ref, len_ref, h0_ref = refs[0], refs[1], refs[2]
        w_refs = refs[3:3 + 4 * num_layers]
        y_ref = refs[3 + 4 * num_layers]
        hf_ref = refs[4 + 4 * num_layers]
        buf = refs[5 + 4 * num_layers] if num_layers > 1 else None

        lens = len_ref[...]                         # (B, 1) int32, loaded once

        def load_from(ref, prefix=None):
            if prefix is None:
                return lambda t: ref[t]
            return lambda t: ref[prefix, t]

        def store_to(ref, prefix=None):
            if prefix is None:
                def _s(t, v):
                    ref[t] = v
            else:
                def _s(t, v):
                    ref[prefix, t] = v
            return _s

        def run_layer(load_x, store_y, w_ih_ref, w_hh_ref, b_ih_ref, b_hh_ref, h0):
            wih = w_ih_ref[...]                     # (Din, 3H)
            whh = w_hh_ref[...]                     # (H,   3H)
            bih = b_ih_ref[...]                     # (1,   3H)
            bhh = b_hh_ref[...]                     # (1,   3H)

            def step(t, h):
                x = load_x(t)                       # (B, Din)
                gi = jnp.dot(x, wih, preferred_element_type=jnp.float32) + bih
                gh = jnp.dot(h, whh, preferred_element_type=jnp.float32) + bhh
                r = jax.nn.sigmoid(gi[:, 0 * H:1 * H] + gh[:, 0 * H:1 * H])
                z = jax.nn.sigmoid(gi[:, 1 * H:2 * H] + gh[:, 1 * H:2 * H])
                n = jnp.tanh(gi[:, 2 * H:3 * H] + r * gh[:, 2 * H:3 * H])
                h_new = (1.0 - z) * n + z * h
                m = (t < lens).astype(jnp.float32)  # (B, 1) validity mask
                store_y(t, m * h_new)               # padded outputs are zero
                return m * h_new + (1.0 - m) * h    # freeze past sequence end

            return lax.fori_loop(0, T, step, h0, unroll=(T <= 32))

        for l in range(num_layers):
            load_x = load_from(x_ref) if l == 0 else load_from(buf, (l - 1) % 2)
            store_y = (store_to(y_ref) if l == num_layers - 1
                       else store_to(buf, l % 2))
            w_ih_ref, w_hh_ref, b_ih_ref, b_hh_ref = w_refs[4 * l: 4 * l + 4]
            hf = run_layer(load_x, store_y, w_ih_ref, w_hh_ref, b_ih_ref,
                           b_hh_ref, h0_ref[l])
            hf_ref[l] = hf

    return kernel


def gru_stack(x_tm, lens, h0, layer_params):
    T, B, _ = x_tm.shape
    L = len(layer_params)
    H = h0.shape[-1]
    args = [x_tm, lens, h0]
    for lp in layer_params:
        args += [lp["w_ih"], lp["w_hh"], lp["b_ih"], lp["b_hh"]]
    scratch = [pltpu.VMEM((2, T, B, H), jnp.float32)] if L > 1 else []
    y, hf = pl.pallas_call(
        _make_gru_stack_kernel(L, T, H),
        out_shape=[jax.ShapeDtypeStruct((T, B, H), jnp.float32),
                   jax.ShapeDtypeStruct((L, B, H), jnp.float32)],
        scratch_shapes=scratch,
    )(*args)
    return y, hf


# ------------------------------------------------------------------------
# Kernel 3: single fused output projection
#   sum_k sub_k @ W_k + bias  ==  concat(sub_k) @ concat_rows(W_k) + bias
#   vocab dim padded to a multiple of 128 for lane-dense stores
# ------------------------------------------------------------------------
def _outproj_kernel(s_ref, w_ref, b_ref, o_ref):
    o_ref[...] = (jnp.dot(s_ref[...], w_ref[...],
                          preferred_element_type=jnp.float32) + b_ref[...])


def out_projection(sub_cat, w_cat, bias):
    M, _ = sub_cat.shape
    V = w_cat.shape[-1]
    Vp = ((V + 127) // 128) * 128
    w_p = jnp.pad(w_cat, ((0, 0), (0, Vp - V)))
    b_p = jnp.pad(bias, ((0, 0), (0, Vp - V)))
    out = pl.pallas_call(
        _outproj_kernel,
        out_shape=jax.ShapeDtypeStruct((M, Vp), jnp.float32),
    )(sub_cat, w_p, b_p)
    return out[:, :V]


# ------------------------------------------------------------------------
# Parameter init (deterministic, synthetic) and forward pass wrapper
# ------------------------------------------------------------------------
def init_params(key, vocab_size, embedding_dim, rnn_units, n_layers):
    Dh = embedding_dim // 2
    keys = jax.random.split(key, 6)
    p = {
        "embedding": jax.random.normal(keys[0], (vocab_size, embedding_dim), jnp.float32) * 0.1,
        "pe_w_exp": jax.random.normal(keys[1], (1, Dh), jnp.float32) * 0.1,
        "pe_b_exp": jax.random.normal(keys[2], (1, Dh), jnp.float32) * 0.1,
        "pe_w_ang": jax.random.normal(keys[3], (1, Dh), jnp.float32) * 0.5,
        "bias": jax.random.normal(keys[4], (1, vocab_size), jnp.float32) * 0.1,
    }
    k2 = keys[5]
    subs = []
    for k in range(1, n_layers + 1):
        layers = []
        for l in range(k):
            din = embedding_dim if l == 0 else rnn_units
            k2, a, b, c, d = jax.random.split(k2, 5)
            layers.append(dict(
                # gate-packed layout: columns ordered [r | z | n]
                w_ih=jax.random.normal(a, (din, 3 * rnn_units), jnp.float32) * 0.1,
                w_hh=jax.random.normal(b, (rnn_units, 3 * rnn_units), jnp.float32) * 0.1,
                b_ih=jax.random.normal(c, (1, 3 * rnn_units), jnp.float32) * 0.1,
                b_hh=jax.random.normal(d, (1, 3 * rnn_units), jnp.float32) * 0.1,
            ))
        k2, a, b = jax.random.split(k2, 3)
        subs.append(dict(
            layers=layers,
            linear_w=jax.random.normal(a, (rnn_units, vocab_size), jnp.float32) * 0.1,
            init_state=jax.random.normal(b, (k, rnn_units), jnp.float32),
        ))
    p["submodels"] = subs
    return p


def decoder_forward(params, inputs, encoding_tensor, lengths, states=None):
    B, T, _ = inputs.shape
    lengths_np = np.asarray(lengths).astype(np.int32)
    T_out = int(lengths_np.max())
    H = params["submodels"][0]["init_state"].shape[-1]
    V = params["bias"].shape[-1]

    # pad batch to a multiple of 8 sublanes; padded rows have length 0
    B_pad = ((B + 7) // 8) * 8
    pad = B_pad - B

    tok = inputs[..., 0]
    pos = inputs[..., 1].astype(jnp.float32)
    enc = encoding_tensor
    if pad:
        tok = jnp.pad(tok, ((0, pad), (0, 0)))
        pos = jnp.pad(pos, ((0, pad), (0, 0)))
        enc = jnp.pad(enc, ((0, pad), (0, 0)))
    lens_dev = jnp.asarray(
        np.concatenate([lengths_np, np.zeros(pad, np.int32)]), jnp.int32)[:, None]

    # time-major activations; only the tiny index arrays are transposed here
    tok_tm = jnp.transpose(tok, (1, 0))                        # (T, B_pad)
    pos_tm = jnp.transpose(pos, (1, 0))
    # embedding gather is glue; the elementwise / trig hot path is in Pallas
    emb_x = jnp.take(params["embedding"], tok_tm, axis=0)      # (T, B_pad, D)
    x_tm = embed_pos_add(emb_x, pos_tm, enc,
                         params["pe_w_exp"], params["pe_b_exp"], params["pe_w_ang"])

    if states is None:
        states_p = [jnp.broadcast_to(sub["init_state"][:, None, :],
                                     (len(sub["layers"]), B_pad, H))
                    for sub in params["submodels"]]
    else:
        states_p = [jnp.pad(s, ((0, 0), (0, pad), (0, 0))) for s in states]

    sub_tops, new_states = [], []
    for si, sub in enumerate(params["submodels"]):
        y, hf = gru_stack(x_tm, lens_dev, states_p[si], sub["layers"])
        new_states.append(hf[:, :B, :])                        # (L, B, H)
        sub_tops.append(y[:T_out].reshape(T_out * B_pad, H))   # time-major flatten

    s_cat = jnp.concatenate(sub_tops, axis=-1)                 # (M, K*H)
    w_cat = jnp.concatenate([s["linear_w"] for s in params["submodels"]], axis=0)
    out = out_projection(s_cat, w_cat, params["bias"])         # (M, V)
    out = out.reshape(T_out, B_pad, V)[:, :B, :]
    out = jnp.transpose(out, (1, 0, 2))                        # (B, T_out, V)
    return out, new_states


# ------------------------------------------------------------------------
# Pure-JAX reference (sanity check of the Pallas path)
# ------------------------------------------------------------------------
def _ref_gru_layer(x_seq, mask_seq, h0, w_ih, w_hh, b_ih, b_hh):
    H = h0.shape[-1]

    def step(h, xm):
        x, m = xm
        gi = x @ w_ih + b_ih
        gh = h @ w_hh + b_hh
        r = jax.nn.sigmoid(gi[:, :H] + gh[:, :H])
        z = jax.nn.sigmoid(gi[:, H:2 * H] + gh[:, H:2 * H])
        n = jnp.tanh(gi[:, 2 * H:] + r * gh[:, 2 * H:])
        h_new = (1.0 - z) * n + z * h
        h_next = m * h_new + (1.0 - m) * h
        return h_next, m * h_new

    hf, ys = lax.scan(step, h0, (x_seq, mask_seq))
    return ys, hf


def ref_decoder(params, inputs, encoding_tensor, lengths):
    B, T, _ = inputs.shape
    lengths_np = np.asarray(lengths)
    T_out = int(lengths_np.max())
    H = params["submodels"][0]["init_state"].shape[-1]

    tok = inputs[..., 0]
    pos = inputs[..., 1].astype(jnp.float32)
    emb_x = jnp.take(params["embedding"], tok, axis=0)
    p = pos[..., None]
    e = jnp.exp((p * params["pe_w_exp"][0] + params["pe_b_exp"][0]) / 80.0)
    a = p * params["pe_w_ang"][0]
    pe = jnp.concatenate([e * jnp.sin(a), e * jnp.cos(a)], axis=-1)
    x = emb_x + pe + encoding_tensor[:, None, :]
    x_tm = jnp.transpose(x, (1, 0, 2))
    mask_tm = (jnp.arange(T)[:, None] < jnp.asarray(lengths_np)[None, :]
               ).astype(jnp.float32)[..., None]

    out = jnp.broadcast_to(params["bias"][0][None, None, :],
                           (B, T_out, params["bias"].shape[-1]))
    new_states = []
    for sub in params["submodels"]:
        layer_in = x_tm
        hs = []
        y = None
        for l, lp in enumerate(sub["layers"]):
            h0 = jnp.broadcast_to(sub["init_state"][l][None, :], (B, H))
            y, hf = _ref_gru_layer(layer_in, mask_tm, h0,
                                   lp["w_ih"], lp["w_hh"], lp["b_ih"], lp["b_hh"])
            hs.append(hf)
            layer_in = y
        new_states.append(jnp.stack(hs, axis=0))
        top = jnp.transpose(y[:T_out], (1, 0, 2))              # (B, T_out, H)
        out = out + top @ sub["linear_w"]
    return out, new_states


# ------------------------------------------------------------------------
if __name__ == "__main__":
    vocab_size, embedding_dim, rnn_units, n_layers = 48, 32, 32, 3
    B, T = 2, 8

    params = init_params(jax.random.PRNGKey(0), vocab_size, embedding_dim,
                         rnn_units, n_layers)

    k1, k2, k3 = jax.random.split(jax.random.PRNGKey(0), 3)
    tok = jax.random.randint(k1, (B, T), 0, vocab_size, dtype=jnp.int32)
    posf = jax.random.randint(k2, (B, T), 0, 6, dtype=jnp.int32)
    inputs = jnp.stack([tok, posf], axis=-1)                   # (B, T, 2)
    encoding_tensor = jax.random.normal(k3, (B, embedding_dim), jnp.float32)
    lengths = np.array([T, T - 3], dtype=np.int32)

    out, states = decoder_forward(params, inputs, encoding_tensor, lengths)
    jax.block_until_ready(out)

    ref_out, ref_states = ref_decoder(params, inputs, encoding_tensor, lengths)
    assert np.allclose(np.asarray(out), np.asarray(ref_out), atol=1e-4, rtol=1e-4)
    for s, rs in zip(states, ref_states):
        assert np.allclose(np.asarray(s), np.asarray(rs), atol=1e-4, rtol=1e-4)

    print("KERNEL_OK")
</pallas_src>

<mosaic_0001>
module attributes {stable_mosaic.version = 11 : i64} {
  func.func @_embed_pos_kernel(%arg0: memref<8x8x32xf32, #tpu.memory_space<vmem>>, %arg1: memref<8x8xf32, #tpu.memory_space<vmem>>, %arg2: memref<8x32xf32, #tpu.memory_space<vmem>>, %arg3: memref<1x16xf32, #tpu.memory_space<vmem>>, %arg4: memref<1x16xf32, #tpu.memory_space<vmem>>, %arg5: memref<1x16xf32, #tpu.memory_space<vmem>>, %arg6: memref<8x8x32xf32, #tpu.memory_space<vmem>>) attributes {dimension_semantics = [], scalar_prefetch = 0 : i64, scratch_operands = 0 : i64, tpu.core_type = #tpu.core_type<tc>} {
    %c0 = arith.constant 0 : index
    %c0_0 = arith.constant 0 : index
    %0 = vector.load %arg1[%c0, %c0_0] : memref<8x8xf32, #tpu.memory_space<vmem>>, vector<8x8xf32>
    %1 = vector.shape_cast %0 : vector<8x8xf32> to vector<8x8x1xf32>
    %c0_1 = arith.constant 0 : index
    %c0_2 = arith.constant 0 : index
    %2 = vector.load %arg3[%c0_1, %c0_2] : memref<1x16xf32, #tpu.memory_space<vmem>>, vector<1x16xf32>
    %3 = vector.shape_cast %2 : vector<1x16xf32> to vector<16xf32>
    %4 = vector.shape_cast %3 : vector<16xf32> to vector<1x1x16xf32>
    %c0_3 = arith.constant 0 : index
    %c0_4 = arith.constant 0 : index
    %5 = vector.load %arg4[%c0_3, %c0_4] : memref<1x16xf32, #tpu.memory_space<vmem>>, vector<1x16xf32>
    %6 = vector.shape_cast %5 : vector<1x16xf32> to vector<16xf32>
    %7 = vector.shape_cast %6 : vector<16xf32> to vector<1x1x16xf32>
    %c0_5 = arith.constant 0 : index
    %c0_6 = arith.constant 0 : index
    %8 = vector.load %arg5[%c0_5, %c0_6] : memref<1x16xf32, #tpu.memory_space<vmem>>, vector<1x16xf32>
    %9 = vector.shape_cast %8 : vector<1x16xf32> to vector<16xf32>
    %10 = vector.shape_cast %9 : vector<16xf32> to vector<1x1x16xf32>
    %11 = vector.broadcast %1 : vector<8x8x1xf32> to vector<8x8x16xf32>
    %12 = vector.broadcast %4 : vector<1x1x16xf32> to vector<8x8x16xf32>
    %13 = arith.mulf %11, %12 : vector<8x8x16xf32>
    %14 = vector.broadcast %7 : vector<1x1x16xf32> to vector<8x8x16xf32>
    %15 = arith.addf %13, %14 : vector<8x8x16xf32>
    %cst = arith.constant 1.250000e-02 : f32
    %16 = vector.broadcast %cst : f32 to vector<8x8x16xf32>
    %17 = arith.mulf %15, %16 : vector<8x8x16xf32>
    %18 = math.exp %17 : vector<8x8x16xf32>
    %19 = vector.broadcast %1 : vector<8x8x1xf32> to vector<8x8x16xf32>
    %20 = vector.broadcast %10 : vector<1x1x16xf32> to vector<8x8x16xf32>
    %21 = arith.mulf %19, %20 : vector<8x8x16xf32>
    %22 = math.sin %21 : vector<8x8x16xf32>
    %23 = arith.mulf %18, %22 : vector<8x8x16xf32>
    %24 = math.cos %21 : vector<8x8x16xf32>
    %25 = arith.mulf %18, %24 : vector<8x8x16xf32>
    %26 = tpu.concatenate %23, %25 in 2 : vector<8x8x16xf32>, vector<8x8x16xf32> -> vector<8x8x32xf32>
    %c0_7 = arith.constant 0 : index
    %c0_8 = arith.constant 0 : index
    %c0_9 = arith.constant 0 : index
    %27 = vector.load %arg0[%c0_7, %c0_8, %c0_9] : memref<8x8x32xf32, #tpu.memory_space<vmem>>, vector<8x8x32xf32>
    %28 = arith.addf %27, %26 : vector<8x8x32xf32>
    %c0_10 = arith.constant 0 : index
    %c0_11 = arith.constant 0 : index
    %29 = vector.load %arg2[%c0_10, %c0_11] : memref<8x32xf32, #tpu.memory_space<vmem>>, vector<8x32xf32>
    %30 = vector.shape_cast %29 : vector<8x32xf32> to vector<1x8x32xf32>
    %31 = vector.broadcast %30 : vector<1x8x32xf32> to vector<8x8x32xf32>
    %32 = arith.addf %28, %31 : vector<8x8x32xf32>
    %c0_12 = arith.constant 0 : index
    %c0_13 = arith.constant 0 : index
    %c0_14 = arith.constant 0 : index
    %33 = vector.load %arg6[%c0_12, %c0_13, %c0_14] : memref<8x8x32xf32, #tpu.memory_space<vmem>>, vector<8x8x32xf32>
    tpu.vector_store %arg6[%c0_12, %c0_13, %c0_14], %32 {strides = array<i32>} : memref<8x8x32xf32, #tpu.memory_space<vmem>>, vector<8x8x32xf32>,
    return
  }
}

</mosaic_0001>

<bundles_post_ra>
// kernel: tpu_custom_call.1
= control target key start
LH: loop header
LB: loop body
LE: loop exit
PB: predicated region body
PF: predicated region fallthrough
CT: control target
= control target key end

     0   :  { %11 = vsyncpa [#allocation3], 0  ;;  %s3151_s0 = inlined_call_operand.hbm [shape: f32[8,8,32], index: 0, kind: input, shape index: {}]   ;;  %s3152_s1 = inlined_call_operand.hbm [shape: f32[8,8], index: 1, kind: input, shape index: {}]   ;;  %s3153_s2 = inlined_call_operand.hbm [shape: f32[8,32], index: 2, kind: input, shape index: {}]   ;;  %s3154_s3 = inlined_call_operand.vmem [shape: f32[1,16], index: 3, kind: input, shape index: {}]   ;;  %s3155_s4 = inlined_call_operand.vmem [shape: f32[1,16], index: 4, kind: input, shape index: {}]   ;;  %s3156_s5 = inlined_call_operand.vmem [shape: f32[1,16], index: 5, kind: input, shape index: {}]   ;;  %s3157_s6 = inlined_call_operand.hbm [shape: f32[8,8,32], index: 6, kind: output, shape index: {}]  }
   0x1   :  { %12 = vsyncpa [#allocation6], 0 }
   0x2   :  { %13 = vsyncpa [#allocation4], 0  ;;  %s2208_s21 = smov [#allocation5]   ;;  %s2209_s23 = smov [#allocation2]  }
   0x3   :  { %s32_s22 = sshll.u32 %s2208_s21, 4  ;;  %s19_s24 = sshll.u32 %s2209_s23, 4  ;;  %s33_s22 = int_to_ptr.vmem [resolvable:$true] %s32_s22  ;;  %s2256_s24 = int_to_ptr.vmem [resolvable:$true] %s19_s24 }
   0x4   :  { %s2114_s27 = scalar_lea.hbm %s3152_s1, 128 }
   0x5   :  { %p2115_p0 = scmp.ne.s32.totalorder %s3152_s1, %s2114_s27  ;;  %p2118_p1 = scmp.lt.u32.totalorder %s2114_s27, %s3152_s1 }
   0x7   :  { %p2120_p2 = pnand %p2118_p1, %p2115_p0 }
   0x9   :  { %2123 = shalt.err (!%p2120_p2)
}
   0xa   :  { %s2124_s8 = scalar_lea.vmem %s33_s22, 128  ;;  %p2129_p4 = scmp.lt.s32.totalorder %s33_s22, %s33_s22 }
   0xb   :  { %p2125_p3 = scmp.ne.s32.totalorder %s33_s22, %s2124_s8  ;;  %p2130_p5 = scmp.lt.s32.totalorder %s2124_s8, %s2124_s8 }
   0xd   :  { %p2131_p6 = por %p2130_p5, %p2129_p4 }
   0xf   :  { %p2132_p7 = pnand %p2131_p6, %p2125_p3 }
  0x11   :  { %2135 = shalt.err (!%p2132_p7)
}
  0x12   :  { %35 = dma.hbm_to_vmem [thread:$0]  %s3152_s1, 128, %s33_s22, [#allocation6]  }
  0x13   :  { %s2136_s13 = scalar_lea.hbm %s3151_s0, 1024 }
  0x14   :  { %p2137_p8 = scmp.ne.s32.totalorder %s3151_s0, %s2136_s13  ;;  %p2140_p9 = scmp.lt.u32.totalorder %s2136_s13, %s3151_s0 }
  0x16   :  { %p2142_p10 = pnand %p2140_p9, %p2137_p8 }
  0x18   :  { %2145 = shalt.err (!%p2142_p10)
}
  0x19   :  { %s2146_s18 = scalar_lea.vmem %s2256_s24, 1024  ;;  %p2151_p12 = scmp.lt.s32.totalorder %s2256_s24, %s2256_s24 }
  0x1a   :  { %p2147_p11 = scmp.ne.s32.totalorder %s2256_s24, %s2146_s18  ;;  %p2152_p13 = scmp.lt.s32.totalorder %s2146_s18, %s2146_s18 }
  0x1c   :  { %p2153_p0 = por %p2152_p13, %p2151_p12 }
  0x1e   :  { %p2154_p1 = pnand %p2153_p0, %p2147_p11 }
  0x20   :  { %2157 = shalt.err (!%p2154_p1)
}
  0x21   :  { %s2210_s1 = smov 128   ;;  %s2211_s19 = smov 8  }
  0x22   :  { %25 = dma.hbm_to_vmem [thread:$0]  %s3151_s0, 1024, %s2256_s24, [#allocation3], %s2210_s1, %s2210_s1, %s2211_s19  }
  0x23   :  { %s2212_s22 = smov [#allocation7]   ;;  %s2158_s27 = scalar_lea.hbm %s3153_s2, 128 }
  0x24   :  { %s42_s23 = sshll.u32 %s2212_s22, 4  ;;  %p2159_p2 = scmp.ne.s32.totalorder %s3153_s2, %s2158_s27  ;;  %s43_s23 = int_to_ptr.vmem [resolvable:$true] %s42_s23 }
  0x25   :  { %p2162_p3 = scmp.lt.u32.totalorder %s2158_s27, %s3153_s2 }
  0x27   :  { %p2164_p4 = pnand %p2162_p3, %p2159_p2 }
  0x29   :  { %2167 = shalt.err (!%p2164_p4)
}
  0x2a   :  { %s2168_s8 = scalar_lea.vmem %s43_s23, 128  ;;  %p2173_p6 = scmp.lt.s32.totalorder %s43_s23, %s43_s23 }
  0x2b   :  { %p2169_p5 = scmp.ne.s32.totalorder %s43_s23, %s2168_s8  ;;  %p2174_p7 = scmp.lt.s32.totalorder %s2168_s8, %s2168_s8 }
  0x2d   :  { %p2175_p8 = por %p2174_p7, %p2173_p6 }
  0x2f   :  { %p2176_p9 = pnand %p2175_p8, %p2169_p5 }
  0x31   :  { %2179 = shalt.err (!%p2176_p9)
}
  0x32   :  { %45 = dma.hbm_to_vmem [thread:$0]  %s3153_s2, 128, %s43_s23, [#allocation6]  }
  0x33   :  { %2202 = dma.done.wait [#allocation3], 1024  }
  0x34   :  { %2203 = vsyncadd [#allocation3], 4294966272 }
  0x35   :  { %2204 = dma.done.wait [#allocation6], 256  }
  0x36   :  { %2205 = vsyncadd [#allocation6], 4294967040  ;;  %v62_v0 = vlaneseq  ;;  %v61_v6 = vld [vmem:[#allocation5] sm:$0xff]  ;;  %v3171_v62 = vmov 683565275   ;;  %s2220_s16 = smov [#allocation8]  }
  0x37   :  { %v2305_v19 = vld [vmem:[%s3154_s3] ss:$0 sm:$0xff]  ;;  %s1939_s17 = sshll.u32 %s2220_s16, 4  ;;  %s1940_s17 = int_to_ptr.vmem [resolvable:$true] %s1939_s17 }
  0x38   :  { %v63_v1 = vshrl.u32 %v62_v0, 7  ;;  %v2310_v20 = vld [vmem:[%s3156_s5] ss:$0 sm:$0xff]  ;;  %v3164_v0 = vmov 2475754826   ;;  %s2180_s18 = scalar_lea.vmem %s1940_s17, 1024  ;;  %p2185_p11 = scmp.lt.s32.totalorder %s1940_s17, %s1940_s17 }
  0x39   :  { %v2315_v23 = vld [vmem:[%s3155_s4] ss:$0 sm:$0xff]  ;;  %p2181_p10 = scmp.ne.s32.totalorder %s1940_s17, %s2180_s18  ;;  %p2186_p12 = scmp.lt.s32.totalorder %s2180_s18, %s2180_s18 }
  0x3a   :  { %v78_v2 = vsub.s32 2, %v63_v1  ;;  %v64_v3 = vsub.s32 0, %v63_v1  ;;  %v85_v4 = vsub.s32 3, %v63_v1  ;;  %v71_v5 = vsub.s32 1, %v63_v1 }
  0x3b   :  { %v99_v11 = vsub.s32 5, %v63_v1  ;;  %v92_v12 = vsub.s32 4, %v63_v1  ;;  %v113_v15 = vsub.s32 7, %v63_v1  ;;  %v106_v16 = vsub.s32 6, %v63_v1  ;;  %p2187_p13 = por %p2186_p12, %p2185_p11 }
  0x3c   :  { %v79_v7 = vrot.slane %v61_v6, %v78_v2  ;;  %v65_v8 = vrot.slane %v61_v6, %v64_v3  ;;  %v86_v9 = vrot.slane %v61_v6, %v85_v4  ;;  %v72_v10 = vrot.slane %v61_v6, %v71_v5 }
  0x3d   :  { %v100_v13 = vrot.slane %v61_v6, %v99_v11  ;;  %v93_v14 = vrot.slane %v61_v6, %v92_v12  ;;  %v114_v17 = vrot.slane %v61_v6, %v113_v15  ;;  %v107_v18 = vrot.slane %v61_v6, %v106_v16  ;;  %p2188_p0 = pnand %p2187_p13, %p2181_p10 }
  0x3e   :  { %81 = vbcast.lane.b32.xlu1 %v79_v7, 256  ;;  %67 = vbcast.lane.b32.xlu0 %v65_v8, 256  ;;  %v3162_v2 = vmov 2131351028   ;;  %v3160_v4 = vmov 2102212464  }
  0x3f   :  { %v3166_v6 = vmov 920167782  }
  0x42   :  { %88 = vbcast.lane.b32.xlu1 %v86_v9, 256  ;;  %74 = vbcast.lane.b32.xlu0 %v72_v10, 256 }
  0x46   :  { %102 = vbcast.lane.b32.xlu1 %v100_v13, 256  ;;  %95 = vbcast.lane.b32.xlu0 %v93_v14, 256  ;;  %v3169_v14 = vmov 1326507024  }
  0x4a   :  { %116 = vbcast.lane.b32.xlu1 %v114_v17, 256  ;;  %109 = vbcast.lane.b32.xlu0 %v107_v18, 256 }
  0xb0   :  { %v82_v21 = vpop.permute.xlu1 %81  ;;  %v68_v22 = vpop.permute.xlu0 %67 }
  0xb1   :  { %v129_v24 = vmul.f32 %v2305_v19, %v82_v21  ;;  %v2319_v25 = vmul.f32 %v2310_v20, %v82_v21  ;;  %v127_v26 = vmul.f32 %v2305_v19, %v68_v22  ;;  %v2323_v27 = vmul.f32 %v2310_v20, %v68_v22 }
  0xb3   :  { %v395_v28 = vand.u32 2147483647, %v2319_v25  ;;  %v398_v29 = vand.u32 2139095040, %v2319_v25  ;;  %v143_v30 = vadd.f32 %v2315_v23, %v129_v24  ;;  %v141_v31 = vadd.f32 %v2315_v23, %v127_v26 }
  0xb4   :  { %v187_v32 = vand.u32 2147483647, %v2323_v27  ;;  %v190_v33 = vand.u32 2139095040, %v2323_v27  ;;  %v89_v35 = vpop.permute.xlu1 %88 }
  0xb5   :  { %v399_v34 = vshrl.u32 %v398_v29, 23  ;;  %v402_v36 = vand.u32 8388607, %v395_v28  ;;  %v151_v40 = vmul.f32 0.0125, %v143_v30  ;;  %v2336_v42 = vmul.f32 %v2310_v20, %v89_v35 }
  0xb6   :  { %v191_v38 = vshrl.u32 %v190_v33, 23  ;;  %v194_v39 = vand.u32 8388607, %v187_v32  ;;  %v149_v41 = vmul.f32 0.0125, %v141_v31  ;;  %v130_v45 = vmul.f32 %v2305_v19, %v89_v35 }
  0xb7   :  { %v1963_v37 = vadd.s32 4294967169, %v399_v34  ;;  %v403_v46 = vor.u32 8388608, %v402_v36  ;;  %v499_v48 = vand.u32 2147483647, %v2336_v42  ;;  %v2340_v50 = vmul.f32 1.442695, %v151_v40 }
  0xb8   :  { %v1955_v44 = vadd.s32 4294967169, %v191_v38  ;;  %v195_v47 = vor.u32 8388608, %v194_v39  ;;  %v2342_v52 = vmul.f32 1.442695, %v149_v41  ;;  %v502_v53 = vand.u32 2139095040, %v2336_v42 }
  0xb9   :  { %v405_v43 = vadd.s32 1, %v1963_v37  ;;  %v2346_v56 = vadd.f32 %v2315_v23, %v130_v45  ;;  %v2348_v57 = vshll.u32 %v403_v46, 8  ;;  %v2354_v60 = vand.u32 8388607, %v499_v48 }
  0xba   :  { %v197_v49 = vadd.s32 1, %v1955_v44  ;;  %v2350_v59 = vshll.u32 %v195_v47, 8  ;;  %v503_v8 = vshrl.u32 %v502_v53, 23  ;;  %2064 = vpow2.f32 %v2340_v50 }
  0xbb   :  { %vm406_vm0 = vcmp.gt.s32.totalorder %v405_v43, 0  ;;  %2066 = vpow2.f32 %v2342_v52 }
  0xbc   :  { %v407_v51 = vsel %vm406_vm0, %v405_v43, 0  ;;  %vm198_vm1 = vcmp.gt.s32.totalorder %v197_v49, 0  ;;  %v1967_v41 = vadd.s32 4294967169, %v503_v8 }
  0xbd   :  { %v408_v54 = vshrl.u32 %v407_v51, 5  ;;  %v409_v55 = vand.u32 31, %v407_v51  ;;  %v199_v58 = vsel %vm198_vm1, %v197_v49, 0 }
  0xbe   :  { %v200_v24 = vshrl.u32 %v199_v58, 5  ;;  %v201_v26 = vand.u32 31, %v199_v58 }
  0xbf   :  { %v410_v61 = vsub.s32 32, %v409_v55  ;;  %v412_v63 = vshll.u32 %v3171_v62, %v409_v55  ;;  %v415_v1 = vshll.u32 %v3164_v0, %v409_v55  ;;  %v418_v3 = vshll.u32 %v3162_v2, %v409_v55 }
  0xc0   :  { %v421_v5 = vshll.u32 %v3160_v4, %v409_v55  ;;  %v424_v7 = vshll.u32 %v3166_v6, %v409_v55  ;;  %vm427_vm2 = vcmp.lt.s32.totalorder %v408_v54, 1  ;;  %vm428_vm3 = vcmp.lt.s32.totalorder %v408_v54, 2 }
  0xc1   :  { %v411_v9 = vshrl.u32 %v3171_v62, %v410_v61  ;;  %v413_v10 = vshrl.u32 %v3164_v0, %v410_v61  ;;  %v416_v11 = vshrl.u32 %v3162_v2, %v410_v61  ;;  %v419_v12 = vshrl.u32 %v3160_v4, %v410_v61 }
  0xc2   :  { %v422_v13 = vshrl.u32 %v3166_v6, %v410_v61  ;;  %v425_v15 = vshrl.u32 %v3169_v14, %v410_v61  ;;  %vm429_vm4 = vcmp.lt.s32.totalorder %v408_v54, 3  ;;  %vm430_vm5 = vcmp.lt.s32.totalorder %v408_v54, 4 }
  0xc3   :  { %v414_v16 = vor.u32 %v413_v10, %v412_v63  ;;  %v417_v17 = vor.u32 %v416_v11, %v415_v1  ;;  %v420_v18 = vor.u32 %v419_v12, %v418_v3  ;;  %v202_v37 = vsub.s32 32, %v201_v26 }
  0xc4   :  { %v423_v21 = vor.u32 %v422_v13, %v421_v5  ;;  %v426_v22 = vor.u32 %v425_v15, %v424_v7  ;;  %v204_v46 = vshll.u32 %v3171_v62, %v201_v26  ;;  %v207_v54 = vshll.u32 %v3164_v0, %v201_v26 }
  0xc5   :  { %v431_v29 = vsel %vm427_vm2, %v411_v9, %v414_v16  ;;  %v432_v30 = vsel %vm430_vm5, %v420_v18, 2102212464  ;;  %v435_v31 = vsel %vm427_vm2, %v414_v16, %v417_v17  ;;  %v439_v33 = vsel %vm427_vm2, %v417_v17, %v420_v18 }
  0xc6   :  { %v433_v34 = vsel %vm429_vm4, %v417_v17, %v432_v30  ;;  %v436_v35 = vsel %vm430_vm5, %v423_v21, 920167782  ;;  %v440_v36 = vsel %vm430_vm5, %v426_v22, 1326507024  ;;  %v203_v55 = vshrl.u32 %v3171_v62, %v202_v37 }
  0xc7   :  { %v434_v38 = vsel %vm428_vm3, %v431_v29, %v433_v34  ;;  %v437_v39 = vsel %vm429_vm4, %v420_v18, %v436_v35  ;;  %v441_v40 = vsel %vm429_vm4, %v423_v21, %v440_v36  ;;  %v205_v58 = vshrl.u32 %v3164_v0, %v202_v37 }
  0xc8   :  { %v438_v43 = vsel %vm428_vm3, %v435_v31, %v437_v39  ;;  %v442_v44 = vsel %vm428_vm3, %v439_v33, %v441_v40  ;;  %v450_v45 = vmul.u32 %v2348_v57, %v434_v38  ;;  %v208_v61 = vshrl.u32 %v3162_v2, %v202_v37 }
  0xc9   :  { %v2379_v47 = vmul.u32.u64.low %v2348_v57, %v442_v44  ;;  %v2380_v49 = vmul.u32.u64.high %v2348_v57, %v442_v44, %v2379_v47  ;;  %v2383_v51 = vmul.u32.u64.low %v2348_v57, %v438_v43  ;;  %v2384_v53 = vmul.u32.u64.high %v2348_v57, %v438_v43, %v2383_v51 }
  0xca   :  { %v210_v63 = vshll.u32 %v3162_v2, %v201_v26  ;;  %v211_v1 = vshrl.u32 %v3160_v4, %v202_v37  ;;  %v213_v3 = vshll.u32 %v3160_v4, %v201_v26  ;;  %v214_v5 = vshrl.u32 %v3166_v6, %v202_v37 }
  0xcb   :  { %v206_v7 = vor.u32 %v205_v58, %v204_v46  ;;  %v209_v57 = vor.u32 %v208_v61, %v207_v54  ;;  %v216_v8 = vshll.u32 %v3166_v6, %v201_v26  ;;  %v217_v9 = vshrl.u32 %v3169_v14, %v202_v37  ;;  %v75_v46 = vpop.permute.xlu0 %74 }
  0xcc   :  { %vm452_vm6 = vc.u32 %v2380_v49, %v2383_v51  ;;  %v453_v10 = vadd.s32 1, %v2384_v53  ;;  %v212_v11 = vor.u32 %v211_v1, %v210_v63  ;;  %vm219_vm7 = vcmp.lt.s32.totalorder %v200_v24, 1 }
  0xcd   :  { %v215_v12 = vor.u32 %v214_v5, %v213_v3  ;;  %v218_v13 = vor.u32 %v217_v9, %v216_v8  ;;  %vm220_vm8 = vcmp.lt.s32.totalorder %v200_v24, 2  ;;  %vm221_vm9 = vcmp.lt.s32.totalorder %v200_v24, 3 }
  0xce   :  { %v454_v15 = vsel %vm452_vm6, %v453_v10, %v2384_v53  ;;  %vm222_vm10 = vcmp.lt.s32.totalorder %v200_v24, 4  ;;  %v223_v16 = vsel %vm219_vm7, %v203_v55, %v206_v7  ;;  %v227_v17 = vsel %vm219_vm7, %v206_v7, %v209_v57 }
  0xcf   :  { %v455_v18 = vadd.s32 %v454_v15, %v450_v45  ;;  %v224_v21 = vsel %vm222_vm10, %v212_v11, 2102212464  ;;  %v228_v22 = vsel %vm222_vm10, %v215_v12, 920167782  ;;  %v231_v26 = vsel %vm219_vm7, %v209_v57, %v212_v11 }
  0xd0   :  { %v225_v29 = vsel %vm221_vm9, %v209_v57, %v224_v21  ;;  %v229_v30 = vsel %vm221_vm9, %v212_v11, %v228_v22  ;;  %v232_v31 = vsel %vm222_vm10, %v218_v13, 1326507024  ;;  %v509_v33 = vadd.s32 1, %v1967_v41 }
  0xd1   :  { %v456_v34 = vadd.s32 536870912, %v455_v18  ;;  %v230_v35 = vsel %vm220_vm8, %v227_v17, %v229_v30  ;;  %v233_v36 = vsel %vm221_vm9, %v215_v12, %v232_v31  ;;  %v507_v37 = vor.u32 8388608, %v2354_v60 }
  0xd2   :  { %v226_v38 = vsel %vm220_vm8, %v223_v16, %v225_v29  ;;  %v234_v39 = vsel %vm220_vm8, %v231_v26, %v233_v36  ;;  %v2406_v40 = vmul.u32.u64.low %v2350_v59, %v230_v35  ;;  %v2407_v43 = vmul.u32.u64.high %v2350_v59, %v230_v35, %v2406_v40 }
  0xd3   :  { %v2410_v44 = vshrl.u32 %v456_v34, 30  ;;  %v2413_v45 = vmul.u32.u64.low %v2350_v59, %v234_v39  ;;  %v2414_v41 = vmul.u32.u64.high %v2350_v59, %v234_v39, %v2413_v45  ;;  %vm510_vm11 = vcmp.gt.s32.totalorder %v509_v33, 0 }
  0xd4   :  { %v511_v60 = vsel %vm510_vm11, %v509_v33, 0  ;;  %v242_v53 = vmul.u32 %v2350_v59, %v226_v38  ;;  %v245_v55 = vadd.s32 1, %v2407_v43  ;;  %v2422_v58 = vmul.f32 0.0125, %v2346_v56  ;;  %v2448_v33 = vpop.eup %2064 }
  0xd5   :  { %v458_v47 = vshll.u32 %v2410_v44, 30  ;;  %v513_v24 = vand.u32 31, %v511_v60  ;;  %v128_v54 = vmul.f32 %v2305_v19, %v75_v46  ;;  %vm244_vm12 = vc.u32 %v2414_v41, %v2406_v40  ;;  %v2450_v35 = vpop.eup %2066 }
  0xd6   :  { %v2429_v63 = vshll.u32 %v507_v37, 8  ;;  %v246_v52 = vsel %vm244_vm12, %v245_v55, %v2407_v43  ;;  %v512_v7 = vshrl.u32 %v511_v60, 5  ;;  %v2455_v60 = vmul.f32 %v2310_v20, %v75_v46  ;;  %v2461_v55 = vpop.permute.xlu1 %102 }
  0xd7   :  { %v2425_v61 = vsub.s32 %v455_v18, %v458_v47  ;;  %v514_v50 = vsub.s32 32, %v513_v24  ;;  %v516_v1 = vshll.u32 %v3171_v62, %v513_v24  ;;  %v519_v59 = vshll.u32 %v3164_v0, %v513_v24 }
  0xd8   :  { %v522_v3 = vshll.u32 %v3162_v2, %v513_v24  ;;  %v247_v5 = vadd.s32 %v246_v52, %v242_v53  ;;  %v525_v10 = vshll.u32 %v3160_v4, %v513_v24  ;;  %v528_v16 = vshll.u32 %v3166_v6, %v513_v24 }
  0xd9   :  { %v461_v56 = vsub.s32 0, %v2425_v61  ;;  %v517_v57 = vshrl.u32 %v3164_v0, %v514_v50  ;;  %v520_v8 = vshrl.u32 %v3162_v2, %v514_v50  ;;  %v523_v9 = vshrl.u32 %v3160_v4, %v514_v50 }
  0xda   :  { %v526_v11 = vshrl.u32 %v3166_v6, %v514_v50  ;;  %v248_v13 = vadd.s32 536870912, %v247_v5  ;;  %v529_v22 = vshrl.u32 %v3169_v14, %v514_v50  ;;  %v515_v30 = vshrl.u32 %v3171_v62, %v514_v50 }
  0xdb   :  { %v1964_v12 = vmin.u32 %v461_v56, %v2425_v61  ;;  %v518_v15 = vor.u32 %v517_v57, %v516_v1  ;;  %v521_v17 = vor.u32 %v520_v8, %v519_v59  ;;  %v524_v18 = vor.u32 %v523_v9, %v522_v3 }
  0xdc   :  { %v527_v21 = vor.u32 %v526_v11, %v525_v10  ;;  %v2444_v29 = vshrl.u32 %v248_v13, 30  ;;  %v142_v31 = vadd.f32 %v2315_v23, %v128_v54  ;;  %v530_v34 = vor.u32 %v529_v22, %v528_v16 }
  0xdd   :  { %v463_v26 = vclz %v1964_v12  ;;  %vm531_vm13 = vcmp.lt.s32.totalorder %v512_v7, 1  ;;  %vm532_vm14 = vcmp.lt.s32.totalorder %v512_v7, 2  ;;  %vm533_vm15 = vcmp.lt.s32.totalorder %v512_v7, 3 }
  0xde   :  { %v250_v37 = vshll.u32 %v2444_v29, 30  ;;  %vm534_vm0 = vcmp.lt.s32.totalorder %v512_v7, 4  ;;  %v539_v38 = vsel %vm531_vm13, %v518_v15, %v521_v17  ;;  %v543_v53 = vsel %vm531_vm13, %v521_v17, %v524_v18 }
  0xdf   :  { %v1965_v36 = vadd.s32 4294967294, %v463_v26  ;;  %v536_v39 = vsel %vm534_vm0, %v524_v18, 2102212464  ;;  %v540_v43 = vsel %vm534_vm0, %v527_v21, 920167782  ;;  %v132_v1 = vmul.f32 %v2305_v19, %v2461_v55 }
  0xe0   :  { %v544_v45 = vsel %vm534_vm0, %v530_v34, 1326507024  ;;  %v2457_v47 = vsub.s32 %v247_v5, %v250_v37  ;;  %v541_v24 = vsel %vm533_vm15, %v524_v18, %v540_v43  ;;  %v535_v3 = vsel %vm531_vm13, %v515_v30, %v518_v15 }
  0xe1   :  { %vm1966_vm1 = vcmp.lt.s32.totalorder %v1965_v36, 0  ;;  %v542_v50 = vsel %vm532_vm14, %v539_v38, %v541_v24  ;;  %v545_v52 = vsel %vm533_vm15, %v527_v21, %v544_v45  ;;  %v537_v56 = vsel %vm533_vm15, %v521_v17, %v536_v39 }
  0xe2   :  { %v466_v54 = vsel %vm1966_vm1, 0, %v1965_v36  ;;  %v253_v46 = vsub.s32 0, %v2457_v47  ;;  %v546_v57 = vsel %vm532_vm14, %v543_v53, %v545_v52  ;;  %v451_v10 = vadd.s32 %v2383_v51, %v2380_v49 }
  0xe3   :  { %v471_v59 = vsub.s32 4294967266, %v466_v54  ;;  %v467_v5 = vsub.s32 32, %v466_v54  ;;  %v2472_v8 = vmul.u32.u64.low %v2429_v63, %v542_v50  ;;  %v2473_v9 = vmul.u32.u64.high %v2429_v63, %v542_v50, %v2472_v8 }
  0xe4   :  { %v1956_v12 = vmin.u32 %v253_v46, %v2457_v47  ;;  %v291_v13 = vand.u32 2147483647, %v2455_v60  ;;  %v538_v16 = vsel %vm532_vm14, %v535_v3, %v537_v56  ;;  %v294_v18 = vand.u32 2139095040, %v2455_v60 }
  0xe5   :  { %v472_v11 = vadd.s32 127, %v471_v59  ;;  %v2481_v15 = vmul.u32.u64.low %v2429_v63, %v546_v57  ;;  %v2482_v17 = vmul.u32.u64.high %v2429_v63, %v546_v57, %v2481_v15  ;;  %v163_v26 = vmul.f32 1.442695, %v2422_v58 }
  0xe6   :  { %v255_v22 = vclz %v1956_v12  ;;  %v150_v30 = vmul.f32 0.0125, %v142_v31  ;;  %v469_v34 = vshrl.u32 %v451_v10, %v467_v5  ;;  %v557_v49 = vadd.s32 1, %v2473_v9 }
  0xe7   :  { %v473_v21 = vshll.u32 %v472_v11, 23  ;;  %v295_v51 = vshrl.u32 %v294_v18, 23  ;;  %v146_v36 = vadd.f32 %v2315_v23, %v132_v1  ;;  %v468_v7 = vshll.u32 %v2425_v61, %v466_v54 }
  0xe8   :  { %v1957_v37 = vadd.s32 4294967294, %v255_v22  ;;  %v554_v38 = vmul.u32 %v2429_v63, %v538_v16  ;;  %v298_v39 = vand.u32 8388607, %v291_v13  ;;  %vm556_vm2 = vc.u32 %v2482_v17, %v2472_v8 }
  0xe9   :  { %v474_v43 = vor.u32 4788187, %v473_v21  ;;  %v1959_v45 = vadd.s32 4294967169, %v295_v51  ;;  %v154_v58 = vmul.f32 0.0125, %v146_v36  ;;  %2068 = vpow2.f32 %v163_v26 }
  0xea   :  { %vm1958_vm3 = vcmp.lt.s32.totalorder %v1957_v37, 0  ;;  %v558_v31 = vsel %vm556_vm2, %v557_v49, %v2473_v9  ;;  %v159_v24 = vmul.f32 1.442695, %v150_v30  ;;  %v470_v53 = vor.u32 %v469_v34, %v468_v7 }
  0xeb   :  { %v258_v50 = vsel %vm1958_vm3, 0, %v1957_v37  ;;  %v559_v52 = vadd.s32 %v558_v31, %v554_v38  ;;  %v301_v61 = vadd.s32 1, %v1959_v45  ;;  %v243_v63 = vadd.s32 %v2406_v40, %v2414_v41 }
  0xec   :  { %v259_v54 = vsub.s32 32, %v258_v50  ;;  %v263_v1 = vsub.s32 4294967266, %v258_v50  ;;  %v299_v59 = vor.u32 8388608, %v298_v39  ;;  %v475_v46 = vand.u32 2147483647, %v474_v43 }
  0xed   :  { %v560_v3 = vadd.s32 536870912, %v559_v52  ;;  %vm302_vm4 = vcmp.gt.s32.totalorder %v301_v61, 0  ;;  %v167_v56 = vmul.f32 1.442695, %v154_v58  ;;  %v260_v5 = vshll.u32 %v2457_v47, %v258_v50 }
  0xee   :  { %v261_v57 = vshrl.u32 %v243_v63, %v259_v54  ;;  %v264_v10 = vadd.s32 127, %v263_v1  ;;  %v303_v9 = vsel %vm302_vm4, %v301_v61, 0  ;;  %v477_v11 = vcvt.s32.f32 %v470_v53 }
  0xef   :  { %v2497_v12 = vshrl.u32 %v560_v3, 30  ;;  %2070 = vpow2.f32 %v159_v24  ;;  %v305_v16 = vand.u32 31, %v303_v9  ;;  %v2500_v40 = vadd.s32 %v2472_v8, %v2482_v17 }
  0xf0   :  { %v262_v15 = vor.u32 %v261_v57, %v260_v5  ;;  %v265_v18 = vshll.u32 %v264_v10, 23  ;;  %v2504_v41 = vmul.f32 %v2310_v20, %v2461_v55  ;;  %vm397_vm5 = vcmp.lt.s32.totalorder %v2319_v25, 0 }
  0xf1   :  { %v478_v47 = vmul.f32 %v477_v11, %v475_v46  ;;  %v562_v21 = vshll.u32 %v2497_v12, 30  ;;  %v306_v22 = vsub.s32 32, %v305_v16  ;;  %v2508_v26 = vshll.u32 %v299_v59, 8 }
  0xf2   :  { %v266_v30 = vor.u32 4788187, %v265_v18  ;;  %v304_v34 = vshrl.u32 %v303_v9, 5  ;;  %v308_v49 = vshll.u32 %v3171_v62, %v305_v16  ;;  %2072 = vpow2.f32 %v167_v56 }
  0xf3   :  { %v269_v51 = vcvt.s32.f32 %v262_v15  ;;  %v2511_v8 = vsub.s32 %v559_v52, %v562_v21  ;;  %v309_v17 = vshrl.u32 %v3164_v0, %v306_v22  ;;  %v311_v55 = vshll.u32 %v3164_v0, %v305_v16  ;;  %v2515_v36 = vpop.eup %2068 }
  0xf4   :  { %3186 = vst [vmem:[#allocation12_spill] sm:$0xff] %v2515_v36  ;;  %vm2519_vm6 = vcmp.le.f32.partialorder %v395_v28, 0.7853982  ;;  %vm189_vm7 = vcmp.lt.s32.totalorder %v2323_v27, 0  ;;  %v267_v37 = vand.u32 2147483647, %v266_v30  ;;  %v312_v38 = vshrl.u32 %v3162_v2, %v306_v22 }
  0xf5   :  { %v314_v39 = vshll.u32 %v3162_v2, %v305_v16  ;;  %v315_v43 = vshrl.u32 %v3160_v4, %v306_v22  ;;  %v479_v45 = vxor.u32 2147483648, %v478_v47  ;;  %v565_v58 = vsub.s32 0, %v2511_v8 }
  0xf6   :  { %v317_v31 = vshll.u32 %v3160_v4, %v305_v16  ;;  %v318_v24 = vshrl.u32 %v3166_v6, %v306_v22  ;;  %v270_v28 = vmul.f32 %v269_v51, %v267_v37  ;;  %v310_v53 = vor.u32 %v309_v17, %v308_v49 }
  0xf7   :  { %v313_v50 = vor.u32 %v312_v38, %v311_v55  ;;  %v316_v52 = vor.u32 %v315_v43, %v314_v39  ;;  %v1968_v61 = vmin.u32 %v565_v58, %v2511_v8  ;;  %v320_v54 = vshll.u32 %v3166_v6, %v305_v16 }
  0xf8   :  { %v319_v63 = vor.u32 %v318_v24, %v317_v31  ;;  %v321_v1 = vshrl.u32 %v3169_v14, %v306_v22  ;;  %v307_v59 = vshrl.u32 %v3171_v62, %v306_v22  ;;  %vm323_vm8 = vcmp.lt.s32.totalorder %v304_v34, 1 }
  0xf9   :  { %vm326_vm9 = vcmp.lt.s32.totalorder %v304_v34, 4  ;;  %v3159_v46 = vand.u32 2147483647, %v2504_v41  ;;  %v2535_v3 = vpop.eup %2070  ;;  %v271_v56 = vxor.u32 2147483648, %v270_v28  ;;  %v567_v5 = vclz %v1968_v61 }
  0xfa   :  { %3189 = vst [vmem:[#allocation13_spill] sm:$0xff] %v2535_v3  ;;  %v322_v57 = vor.u32 %v321_v1, %v320_v54  ;;  %v328_v10 = vsel %vm326_vm9, %v316_v52, 2102212464  ;;  %v480_v9 = vsel %vm397_vm5, %v479_v45, %v478_v47  ;;  %vm325_vm10 = vcmp.lt.s32.totalorder %v304_v34, 3 }
  0xfb   :  { %v331_v11 = vsel %vm323_vm8, %v310_v53, %v313_v50  ;;  %v332_v16 = vsel %vm326_vm9, %v319_v63, 920167782  ;;  %v1969_v15 = vadd.s32 4294967294, %v567_v5  ;;  %vm324_vm11 = vcmp.lt.s32.totalorder %v304_v34, 2 }
  0xfc   :  { %v327_v18 = vsel %vm323_vm8, %v307_v59, %v310_v53  ;;  %v333_v21 = vsel %vm325_vm10, %v316_v52, %v332_v16  ;;  %v2543_v22 = vpop.eup %2072  ;;  %v329_v30 = vsel %vm325_vm10, %v313_v50, %v328_v10  ;;  %v335_v51 = vsel %vm323_vm8, %v313_v50, %v316_v52  ;;  %v96_v50 = vpop.permute.xlu0 %95 }
  0xfd   :  { %3190 = vst [vmem:[#allocation14_spill] sm:$0xff] %v2543_v22  ;;  %v334_v49 = vsel %vm324_vm11, %v331_v11, %v333_v21  ;;  %v336_v17 = vsel %vm326_vm9, %v322_v57, 1326507024  ;;  %v483_v47 = vsel %vm2519_vm6, %v2319_v25, %v480_v9  ;;  %v272_v55 = vsel %vm189_vm7, %v271_v56, %v270_v28 }
  0xfe   :  { %vm1970_vm12 = vcmp.lt.s32.totalorder %v1969_v15, 0  ;;  %v337_v37 = vsel %vm325_vm10, %v319_v63, %v336_v17  ;;  %v2555_v43 = vmul.u32.u64.low %v2508_v26, %v334_v49  ;;  %v2556_v45 = vmul.u32.u64.high %v2508_v26, %v334_v49, %v2555_v43 }
  0xff   :  { %v570_v38 = vsel %vm1970_vm12, 0, %v1969_v15  ;;  %v338_v39 = vsel %vm324_vm11, %v335_v51, %v337_v37  ;;  %v330_v24 = vsel %vm324_vm11, %v327_v18, %v329_v30  ;;  %v710_v53 = vand.u32 2139095040, %v2504_v41  ;;  %v2588_v30 = vpop.permute.xlu1 %116 }
 0x100   :  { %v571_v58 = vsub.s32 32, %v570_v38  ;;  %v575_v31 = vsub.s32 4294967266, %v570_v38  ;;  %v572_v52 = vshll.u32 %v2511_v8, %v570_v38  ;;  %v131_v63 = vmul.f32 %v2305_v19, %v96_v50 }
 0x101   :  { %v2563_v28 = vmul.u32.u64.low %v2508_v26, %v338_v39  ;;  %v2564_v61 = vmul.u32.u64.high %v2508_v26, %v338_v39, %v2563_v28  ;;  %v711_v59 = vshrl.u32 %v710_v53, 23  ;;  %v714_v56 = vand.u32 8388607, %v3159_v46 }
 0x102   :  { %v573_v54 = vshrl.u32 %v2500_v40, %v571_v58  ;;  %v576_v1 = vadd.s32 127, %v575_v31  ;;  %2074 = vcosq.f32 %v483_v47  ;;  %vm2572_vm13 = vcmp.le.f32.partialorder %v187_v32, 0.7853982 }
 0x103   :  { %v349_v8 = vadd.s32 1, %v2556_v45  ;;  %v145_v5 = vadd.f32 %v2315_v23, %v131_v63  ;;  %2076 = vsinq.f32 %v483_v47  ;;  %v1975_v40 = vadd.s32 4294967169, %v711_v59 }
 0x104   :  { %v574_v57 = vor.u32 %v573_v54, %v572_v52  ;;  %v577_v10 = vshll.u32 %v576_v1, 23  ;;  %v275_v9 = vsel %vm2572_vm13, %v2323_v27, %v272_v55  ;;  %v346_v11 = vmul.u32 %v2508_v26, %v330_v24 }
 0x105   :  { %vm348_vm14 = vc.u32 %v2564_v61, %v2555_v43  ;;  %v2585_v32 = vmul.f32 %v2310_v20, %v96_v50  ;;  %v715_v18 = vor.u32 8388608, %v714_v56  ;;  %v717_v21 = vadd.s32 1, %v1975_v40 }
 0x106   :  { %v578_v16 = vor.u32 4788187, %v577_v10  ;;  %v350_v15 = vsel %vm348_vm14, %v349_v8, %v2556_v45  ;;  %v153_v51 = vmul.f32 0.0125, %v145_v5  ;;  %v134_v26 = vmul.f32 %v2305_v19, %v2588_v30 }
 0x107   :  { %v351_v49 = vadd.s32 %v350_v15, %v346_v11  ;;  %v3158_v17 = vand.u32 2147483647, %v2585_v32  ;;  %2078 = vcosq.f32 %v275_v9  ;;  %v581_v55 = vcvt.s32.f32 %v574_v57 }
 0x108   :  { %v579_v47 = vand.u32 2147483647, %v578_v16  ;;  %vm718_vm15 = vcmp.gt.s32.totalorder %v717_v21, 0  ;;  %2080 = vsinq.f32 %v275_v9  ;;  %vm3183_vm0 = vcmp.lt.s32.totalorder %v2336_v42, 0 }
 0x109   :  { %v352_v37 = vadd.s32 536870912, %v351_v49  ;;  %v719_v38 = vsel %vm718_vm15, %v717_v21, 0  ;;  %v2594_v58 = vshll.u32 %v715_v18, 8  ;;  %v606_v31 = vand.u32 2139095040, %v2585_v32 }
 0x10a   :  { %v582_v39 = vmul.f32 %v581_v55, %v579_v47  ;;  %v721_v45 = vand.u32 31, %v719_v38  ;;  %v165_v53 = vmul.f32 1.442695, %v153_v51  ;;  %v2601_v50 = vand.u32 8388607, %v3158_v17 }
 0x10b   :  { %v2597_v24 = vshrl.u32 %v352_v37, 30  ;;  %v2604_v52 = vadd.f32 %v2315_v23, %v134_v26  ;;  %v720_v28 = vshrl.u32 %v719_v38, 5  ;;  %vm2617_vm1 = vcmp.le.f32.partialorder %v499_v48, 0.7853982 }
 0x10c   :  { %v722_v63 = vsub.s32 32, %v721_v45  ;;  %v724_v54 = vshll.u32 %v3171_v62, %v721_v45  ;;  %v727_v1 = vshll.u32 %v3164_v0, %v721_v45  ;;  %v2608_v59 = vpop.eup %2074  ;;  %v583_v56 = vxor.u32 2147483648, %v582_v39 }
 0x10d   :  { %v354_v8 = vshll.u32 %v2597_v24, 30  ;;  %v730_v5 = vshll.u32 %v3162_v2, %v721_v45  ;;  %v733_v57 = vshll.u32 %v3160_v4, %v721_v45  ;;  %v2613_v10 = vpop.eup %2076  ;;  %v736_v11 = vshll.u32 %v3166_v6, %v721_v45 }
 0x10e   :  { %v725_v40 = vshrl.u32 %v3164_v0, %v722_v63  ;;  %v728_v9 = vshrl.u32 %v3162_v2, %v722_v63  ;;  %v607_v16 = vshrl.u32 %v606_v31, 23  ;;  %v723_v18 = vshrl.u32 %v3171_v62, %v722_v63 }
 0x10f   :  { %v2624_v15 = vsub.s32 %v351_v49, %v354_v8  ;;  %v731_v21 = vshrl.u32 %v3160_v4, %v722_v63  ;;  %v734_v51 = vshrl.u32 %v3166_v6, %v722_v63  ;;  %v737_v47 = vshrl.u32 %v3169_v14, %v722_v63 }
 0x110   :  { %v726_v26 = vor.u32 %v725_v40, %v724_v54  ;;  %v729_v48 = vor.u32 %v728_v9, %v727_v1  ;;  %v611_v55 = vor.u32 8388608, %v2601_v50  ;;  %v584_v37 = vsel %vm3183_vm0, %v583_v56, %v582_v39 }
 0x111   :  { %v357_v38 = vsub.s32 0, %v2624_v15  ;;  %v732_v45 = vor.u32 %v731_v21, %v730_v5  ;;  %v735_v49 = vor.u32 %v734_v51, %v733_v57  ;;  %v2634_v31 = vpop.eup %2078  ;;  %v738_v8 = vor.u32 %v737_v47, %v736_v11 }
 0x112   :  { %vm739_vm2 = vcmp.lt.s32.totalorder %v720_v28, 1  ;;  %vm740_vm3 = vcmp.lt.s32.totalorder %v720_v28, 2  ;;  %vm741_vm4 = vcmp.lt.s32.totalorder %v720_v28, 3  ;;  %v2636_v17 = vpop.eup %2080  ;;  %vm742_vm8 = vcmp.lt.s32.totalorder %v720_v28, 4 }
 0x113   :  { %v1960_v54 = vmin.u32 %v357_v38, %v2624_v15  ;;  %v743_v63 = vsel %vm739_vm2, %v723_v18, %v726_v26  ;;  %v747_v50 = vsel %vm739_vm2, %v726_v26, %v729_v48  ;;  %v744_v1 = vsel %vm742_vm8, %v732_v45, 2102212464 }
 0x114   :  { %v748_v40 = vsel %vm742_vm8, %v735_v49, 920167782  ;;  %v751_v39 = vsel %vm739_vm2, %v729_v48, %v732_v45  ;;  %v752_v56 = vsel %vm742_vm8, %v738_v8, 1326507024  ;;  %v745_v5 = vsel %vm741_vm4, %v729_v48, %v744_v1 }
 0x115   :  { %v359_v9 = vclz %v1960_v54  ;;  %v749_v57 = vsel %vm741_vm4, %v732_v45, %v748_v40  ;;  %v753_v21 = vsel %vm741_vm4, %v735_v49, %v752_v56  ;;  %v1971_v47 = vadd.s32 4294967169, %v607_v16 }
 0x116   :  { %v750_v11 = vsel %vm740_vm3, %v747_v50, %v749_v57  ;;  %v754_v51 = vsel %vm740_vm3, %v751_v39, %v753_v21  ;;  %v2643_v46 = vmul.f32 %v2310_v20, %v2588_v30  ;;  %v2648_v18 = vsel %vm2617_vm1, %v2336_v42, %v584_v37 }
 0x117   :  { %v1961_v26 = vadd.s32 4294967294, %v359_v9  ;;  %v2651_v38 = vmul.u32.u64.low %v2594_v58, %v754_v51  ;;  %v2652_v48 = vmul.u32.u64.high %v2594_v58, %v754_v51, %v2651_v38  ;;  %v746_v45 = vsel %vm740_vm3, %v743_v63, %v745_v5 }
 0x118   :  { %v2656_v49 = vmul.u32.u64.low %v2594_v58, %v750_v11  ;;  %v2657_v8 = vmul.u32.u64.high %v2594_v58, %v750_v11, %v2656_v49  ;;  %v613_v16 = vadd.s32 1, %v1971_v47  ;;  %v347_v20 = vadd.s32 %v2555_v43, %v2564_v61 }
 0x119   :  { %vm1962_vm9 = vcmp.lt.s32.totalorder %v1961_v26, 0  ;;  %2082 = vpow2.f32 %v165_v53  ;;  %v2663_v37 = vmul.f32 0.0125, %v2604_v52  ;;  %v918_v54 = vand.u32 2139095040, %v2643_v46 }
 0x11a   :  { %v362_v30 = vsel %vm1962_vm9, 0, %v1961_v26  ;;  %vm614_vm10 = vcmp.gt.s32.totalorder %v613_v16, 0  ;;  %2084 = vcosq.f32 %v2648_v18  ;;  %v762_v50 = vmul.u32 %v2594_v58, %v746_v45 }
 0x11b   :  { %v363_v28 = vsub.s32 32, %v362_v30  ;;  %v367_v63 = vsub.s32 4294967266, %v362_v30  ;;  %vm764_vm11 = vc.u32 %v2652_v48, %v2656_v49  ;;  %v765_v43 = vadd.s32 1, %v2657_v8 }
 0x11c   :  { %v615_v61 = vsel %vm614_vm10, %v613_v16, 0  ;;  %v2671_v53 = vshll.u32 %v611_v55, 8  ;;  %v364_v1 = vshll.u32 %v2624_v15, %v362_v30  ;;  %v3168_v5 = vand.u32 2147483647, %v2643_v46 }
 0x11d   :  { %v365_v52 = vshrl.u32 %v347_v20, %v363_v28  ;;  %v368_v40 = vadd.s32 127, %v367_v63  ;;  %v617_v39 = vand.u32 31, %v615_v61  ;;  %v766_v56 = vsel %vm764_vm11, %v765_v43, %v2657_v8 }
 0x11e   :  { %v616_v9 = vshrl.u32 %v615_v61, 5  ;;  %v919_v57 = vshrl.u32 %v918_v54, 23  ;;  %v767_v11 = vadd.s32 %v766_v56, %v762_v50  ;;  %vm3184_vm12 = vcmp.lt.s32.totalorder %v2455_v60, 0 }
 0x11f   :  { %v366_v58 = vor.u32 %v365_v52, %v364_v1  ;;  %v369_v21 = vshll.u32 %v368_v40, 23  ;;  %v618_v51 = vsub.s32 32, %v617_v39  ;;  %v620_v55 = vshll.u32 %v3171_v62, %v617_v39 }
 0x120   :  { %v623_v47 = vshll.u32 %v3164_v0, %v617_v39  ;;  %v626_v15 = vshll.u32 %v3162_v2, %v617_v39  ;;  %v629_v26 = vshll.u32 %v3160_v4, %v617_v39  ;;  %v768_v8 = vadd.s32 536870912, %v767_v11 }
 0x121   :  { %v370_v38 = vor.u32 4788187, %v369_v21  ;;  %v373_v45 = vcvt.s32.f32 %v366_v58  ;;  %v619_v16 = vshrl.u32 %v3171_v62, %v618_v51  ;;  %v621_v20 = vshrl.u32 %v3164_v0, %v618_v51 }
 0x122   :  { %v624_v30 = vshrl.u32 %v3162_v2, %v618_v51  ;;  %v627_v54 = vshrl.u32 %v3160_v4, %v618_v51  ;;  %v630_v28 = vshrl.u32 %v3166_v6, %v618_v51  ;;  %vm2690_vm14 = vcmp.le.f32.partialorder %v291_v13, 0.7853982 }
 0x123   :  { %v2686_v63 = vpop.eup %2082  ;;  %v371_v43 = vand.u32 2147483647, %v370_v38  ;;  %v2694_v61 = vshrl.u32 %v768_v8, 30  ;;  %v632_v1 = vshll.u32 %v3166_v6, %v617_v39  ;;  %v633_v52 = vshrl.u32 %v3169_v14, %v618_v51 }
 0x124   :  { %3195 = vst [vmem:[#allocation15_spill] sm:$0xff] %v2686_v63  ;;  %v622_v40 = vor.u32 %v621_v20, %v620_v55  ;;  %v625_v56 = vor.u32 %v624_v30, %v623_v47  ;;  %v628_v58 = vor.u32 %v627_v54, %v626_v15  ;;  %v631_v21 = vor.u32 %v630_v28, %v629_v26  ;;  %v2698_v4 = vpop.eup %2084  ;;  %v110_v54 = vpop.permute.xlu0 %109 }
 0x125   :  { %3198 = vst [vmem:[#allocation16_spill] sm:$0xff] %v2694_v61  ;;  %v374_v2 = vmul.f32 %v373_v45, %v371_v43  ;;  %v770_v0 = vshll.u32 %v2694_v61, 30  ;;  %v634_v13 = vor.u32 %v633_v52, %v632_v1  ;;  %vm635_vm15 = vcmp.lt.s32.totalorder %v616_v9, 1 }
 0x126   :  { %vm637_vm2 = vcmp.lt.s32.totalorder %v616_v9, 3  ;;  %vm638_vm3 = vcmp.lt.s32.totalorder %v616_v9, 4  ;;  %v639_v38 = vsel %vm635_vm15, %v619_v16, %v622_v40  ;;  %v922_v8 = vand.u32 8388607, %v3168_v5 }
 0x127   :  { %v375_v39 = vxor.u32 2147483648, %v374_v2  ;;  %v2703_v6 = vsub.s32 %v767_v11, %v770_v0  ;;  %v640_v51 = vsel %vm638_vm3, %v628_v58, 2102212464  ;;  %v643_v55 = vsel %vm635_vm15, %v622_v40, %v625_v56 }
 0x128   :  { %v641_v47 = vsel %vm637_vm2, %v625_v56, %v640_v51  ;;  %v644_v15 = vsel %vm638_vm3, %v631_v21, 920167782  ;;  %v647_v26 = vsel %vm635_vm15, %v625_v56, %v628_v58  ;;  %v648_v45 = vsel %vm638_vm3, %v634_v13, 1326507024 }
 0x129   :  { %v376_v20 = vsel %vm3184_vm12, %v375_v39, %v374_v2  ;;  %v773_v30 = vsub.s32 0, %v2703_v6  ;;  %vm636_vm4 = vcmp.lt.s32.totalorder %v616_v9, 2  ;;  %v645_v16 = vsel %vm637_vm2, %v628_v58, %v644_v15 }
 0x12a   :  { %v646_v28 = vsel %vm636_vm4, %v643_v55, %v645_v16  ;;  %v649_v0 = vsel %vm637_vm2, %v631_v21, %v648_v45  ;;  %v171_v11 = vmul.f32 1.442695, %v2663_v37  ;;  %v133_v43 = vmul.f32 %v2305_v19, %v110_v54 }
 0x12b   :  { %v1976_v1 = vmin.u32 %v773_v30, %v2703_v6  ;;  %v642_v52 = vsel %vm636_vm4, %v639_v38, %v641_v47  ;;  %v650_v40 = vsel %vm636_vm4, %v647_v26, %v649_v0  ;;  %v1983_v56 = vadd.s32 4294967169, %v919_v57  ;;  %v2112_v57 = vld [vmem:[%s3155_s4] ss:$0 sm:$0xff] }
 0x12c   :  { %v2717_v2 = vsel %vm2690_vm14, %v2455_v60, %v376_v20  ;;  %v2720_v58 = vmul.u32.u64.low %v2671_v53, %v650_v40  ;;  %v2721_v13 = vmul.u32.u64.high %v2671_v53, %v650_v40, %v2720_v58  ;;  %v923_v9 = vor.u32 8388608, %v922_v8 }
 0x12d   :  { %v775_v21 = vclz %v1976_v1  ;;  %v2724_v37 = vmul.u32.u64.low %v2671_v53, %v646_v28  ;;  %v2725_v39 = vmul.u32.u64.high %v2671_v53, %v646_v28, %v2724_v37  ;;  %v925_v19 = vadd.s32 1, %v1983_v56 }
 0x12e   :  { %2086 = vsinq.f32 %v2648_v18  ;;  %v147_v38 = vadd.f32 %v2112_v57, %v133_v43  ;;  %v763_v51 = vadd.s32 %v2656_v49, %v2652_v48  ;;  %v658_v8 = vmul.u32 %v2671_v53, %v642_v52  ;;  %v2113_v48 = vld [vmem:[%s3156_s5] ss:$0 sm:$0xff]  ;;  %s2219_s5 = smov 16  }
 0x12f   :  { %v1977_v55 = vadd.s32 4294967294, %v775_v21  ;;  %2088 = vpow2.f32 %v171_v11  ;;  %vm926_vm8 = vcmp.gt.s32.totalorder %v925_v19, 0  ;;  %vm660_vm9 = vc.u32 %v2721_v13, %v2724_v37 }
 0x130   :  { %2090 = vcosq.f32 %v2717_v2  ;;  %v927_v47 = vsel %vm926_vm8, %v925_v19, 0  ;;  %v661_v18 = vadd.s32 1, %v2725_v39  ;;  %v2739_v26 = vshll.u32 %v923_v9, 8 }
 0x131   :  { %vm1978_vm10 = vcmp.lt.s32.totalorder %v1977_v55, 0  ;;  %v929_v15 = vand.u32 31, %v927_v47  ;;  %v2741_v20 = vmul.f32 0.0125, %v147_v38  ;;  %v2746_v49 = vmul.f32 %v2113_v48, %v110_v54 }
 0x132   :  { %v778_v45 = vsel %vm1978_vm10, 0, %v1977_v55  ;;  %v662_v0 = vsel %vm660_vm9, %v661_v18, %v2725_v39  ;;  %v3199_v52 = vmov 2475754826   ;;  %v3200_v9 = vmov 2131351028  }
 0x133   :  { %v779_v30 = vsub.s32 32, %v778_v45  ;;  %v780_v16 = vshll.u32 %v2703_v6, %v778_v45  ;;  %v783_v28 = vsub.s32 4294967266, %v778_v45  ;;  %v663_v11 = vadd.s32 %v662_v0, %v658_v8 }
 0x134   :  { %v930_v43 = vsub.s32 32, %v929_v15  ;;  %v932_v1 = vshll.u32 %v3171_v62, %v929_v15  ;;  %v935_v40 = vshll.u32 %v3199_v52, %v929_v15  ;;  %v938_v21 = vshll.u32 %v3200_v9, %v929_v15 }
 0x135   :  { %v781_v56 = vshrl.u32 %v763_v51, %v779_v30  ;;  %v784_v58 = vadd.s32 127, %v783_v28  ;;  %v3201_v54 = vmov 2102212464   ;;  %v664_v57 = vadd.s32 536870912, %v663_v11 }
 0x136   :  { %v941_v19 = vshll.u32 %v3201_v54, %v929_v15  ;;  %v928_v38 = vshrl.u32 %v927_v47, 5  ;;  %v933_v55 = vshrl.u32 %v3199_v52, %v930_v43  ;;  %v936_v6 = vshrl.u32 %v3200_v9, %v930_v43 }
 0x137   :  { %v782_v45 = vor.u32 %v781_v56, %v780_v16  ;;  %v785_v39 = vshll.u32 %v784_v58, 23  ;;  %v939_v8 = vshrl.u32 %v3201_v54, %v930_v43  ;;  %v3202_v18 = vmov 920167782  }
 0x138   :  { %v942_v48 = vshrl.u32 %v3202_v18, %v930_v43  ;;  %v2759_v0 = vpop.eup %2086  ;;  %vm3182_vm11 = vcmp.lt.s32.totalorder %v2504_v41, 0  ;;  %v2762_v51 = vshrl.u32 %v664_v57, 30  ;;  %v934_v30 = vor.u32 %v933_v55, %v932_v1 }
 0x139   :  { %v937_v28 = vor.u32 %v936_v6, %v935_v40  ;;  %v944_v47 = vshll.u32 %v3202_v18, %v929_v15  ;;  %v2765_v5 = vpop.eup %2088  ;;  %v3205_v53 = vand.u32 2147483647, %v2504_v41  ;;  %v786_v56 = vor.u32 4788187, %v785_v39 }
 0x13a   :  { %3203 = vst [vmem:[#allocation17_spill] sm:$0xff] %v2762_v51  ;;  %3204 = vst [vmem:[#allocation18_spill] sm:$0xff] %v2765_v5  ;;  %v940_v58 = vor.u32 %v939_v8, %v938_v21  ;;  %v943_v14 = vor.u32 %v942_v48, %v941_v19  ;;  %v2774_v22 = vpop.eup %2090  ;;  %v789_v57 = vcvt.s32.f32 %v782_v45  ;;  %v666_v1 = vshll.u32 %v2762_v51, 30 }
 0x13b   :  { %vm2769_vm15 = vcmp.le.f32.partialorder %v3205_v53, 0.7853982  ;;  %v3208_v40 = vmov 683565275   ;;  %v3209_v55 = vmov 1326507024   ;;  %2092 = vsinq.f32 %v2717_v2 }
 0x13c   :  { %v931_v15 = vshrl.u32 %v3208_v40, %v930_v43  ;;  %v945_v6 = vshrl.u32 %v3209_v55, %v930_v43  ;;  %v787_v5 = vand.u32 2147483647, %v786_v56  ;;  %vm947_vm2 = vcmp.lt.s32.totalorder %v928_v38, 1 }
 0x13d   :  { %vm948_vm3 = vcmp.lt.s32.totalorder %v928_v38, 2  ;;  %vm950_vm4 = vcmp.lt.s32.totalorder %v928_v38, 4  ;;  %v2779_v53 = vsub.s32 %v663_v11, %v666_v1  ;;  %v955_v19 = vsel %vm947_vm2, %v934_v30, %v937_v28 }
 0x13e   :  { %v946_v39 = vor.u32 %v945_v6, %v944_v47  ;;  %v952_v21 = vsel %vm950_vm4, %v940_v58, 2102212464  ;;  %v790_v8 = vmul.f32 %v789_v57, %v787_v5  ;;  %vm949_vm8 = vcmp.lt.s32.totalorder %v928_v38, 3 }
 0x13f   :  { %v956_v48 = vsel %vm950_vm4, %v943_v14, 920167782  ;;  %v959_v62 = vsel %vm947_vm2, %v937_v28, %v940_v58  ;;  %v669_v45 = vsub.s32 0, %v2779_v53  ;;  %v951_v63 = vsel %vm947_vm2, %v931_v15, %v934_v30 }
 0x140   :  { %v957_v61 = vsel %vm949_vm8, %v940_v58, %v956_v48  ;;  %v960_v36 = vsel %vm950_vm4, %v946_v39, 1326507024  ;;  %v791_v51 = vxor.u32 2147483648, %v790_v8  ;;  %v953_v43 = vsel %vm949_vm8, %v937_v28, %v952_v21 }
 0x141   :  { %v958_v56 = vsel %vm948_vm3, %v955_v19, %v957_v61  ;;  %v961_v3 = vsel %vm949_vm8, %v943_v14, %v960_v36  ;;  %v1972_v11 = vmin.u32 %v669_v45, %v2779_v53  ;;  %v659_v61 = vadd.s32 %v2724_v37, %v2721_v13 }
 0x142   :  { %v962_v47 = vsel %vm948_vm3, %v959_v62, %v961_v3  ;;  %v2786_v1 = vmul.u32.u64.low %v2739_v26, %v958_v56  ;;  %v2787_v5 = vmul.u32.u64.high %v2739_v26, %v958_v56, %v2786_v1  ;;  %v792_v30 = vsel %vm3182_vm11, %v791_v51, %v790_v8 }
 0x143   :  { %v2793_v58 = vmul.u32.u64.low %v2739_v26, %v962_v47  ;;  %v2794_v57 = vmul.u32.u64.high %v2739_v26, %v962_v47, %v2793_v58  ;;  %v795_v14 = vsel %vm2769_vm15, %v2504_v41, %v792_v30  ;;  %v671_v36 = vclz %v1972_v11 }
 0x144   :  { %v954_v62 = vsel %vm948_vm3, %v951_v63, %v953_v43  ;;  %v814_v3 = vand.u32 2139095040, %v2746_v49  ;;  %v3210_v2 = vand.u32 2147483647, %v2746_v49  ;;  %v3211_v51 = vsub.s32 4, %v2444_v29 }
 0x145   :  { %v284_v6 = vxor.u32 2147483648, %v2636_v17  ;;  %v1973_v39 = vadd.s32 4294967294, %v671_v36  ;;  %v973_v38 = vadd.s32 1, %v2787_v5  ;;  %v2813_v63 = vmul.f32 1.442695, %v2741_v20 }
 0x146   :  { %v818_v28 = vand.u32 8388607, %v3210_v2  ;;  %v274_v15 = vsel %vm189_vm7, %v3211_v51, %v2444_v29  ;;  %v815_v21 = vshrl.u32 %v814_v3, 23  ;;  %2094 = vcosq.f32 %v795_v14  ;;  %v2829_v3 = vpop.eup %2092 }
 0x147   :  { %v970_v13 = vmul.u32 %v2739_v26, %v954_v62  ;;  %vm972_vm9 = vc.u32 %v2794_v57, %v2786_v1  ;;  %v276_v37 = vsel %vm2572_vm13, 0, %v274_v15  ;;  %vm1974_vm10 = vcmp.lt.s32.totalorder %v1973_v39, 0 }
 0x148   :  { %v974_v29 = vsel %vm972_vm9, %v973_v38, %v2787_v5  ;;  %v1979_v19 = vadd.s32 4294967169, %v815_v21  ;;  %v280_v8 = vadd.s32 3, %v276_v37  ;;  %v674_v48 = vsel %vm1974_vm10, 0, %v1973_v39  ;;  %v3228_v21 = vld [vmem:[#allocation12_spill] sm:$0xff] }
 0x149   :  { %v975_v45 = vadd.s32 %v974_v29, %v970_v13  ;;  %v819_v43 = vor.u32 8388608, %v818_v28  ;;  %v2820_v56 = vand.u32 3, %v276_v37  ;;  %v675_v20 = vsub.s32 32, %v674_v48 }
 0x14a   :  { %v679_v11 = vsub.s32 4294967266, %v674_v48  ;;  %v821_v47 = vadd.s32 1, %v1979_v19  ;;  %2096 = vsinq.f32 %v795_v14  ;;  %v2824_v30 = vadd.s32 %v2786_v1, %v2794_v57 }
 0x14b   :  { %v976_v34 = vadd.s32 536870912, %v975_v45  ;;  %v2826_v58 = vand.u32 3, %v280_v8  ;;  %v676_v5 = vshll.u32 %v2779_v53, %v674_v48  ;;  %v677_v36 = vshrl.u32 %v659_v61, %v675_v20 }
 0x14c   :  { %v680_v62 = vadd.s32 127, %v679_v11  ;;  %vm822_vm7 = vcmp.gt.s32.totalorder %v821_v47, 0  ;;  %v2833_v51 = vshll.u32 %v819_v43, 8  ;;  %vm1122_vm13 = vcmp.eq.s32.totalorder %v2820_v56, 0 }
 0x14d   :  { %v2831_v2 = vshrl.u32 %v976_v34, 30  ;;  %v823_v28 = vsel %vm822_vm7, %v821_v47, 0  ;;  %v678_v14 = vor.u32 %v677_v36, %v676_v5  ;;  %vm283_vm2 = vcmp.eq.s32.totalorder %v2826_v58, 0 }
 0x14e   :  { %v681_v1 = vshll.u32 %v680_v62, 23  ;;  %v825_v57 = vand.u32 31, %v823_v28  ;;  %vm3185_vm3 = vcmp.lt.s32.totalorder %v2585_v32, 0  ;;  %v824_v61 = vshrl.u32 %v823_v28, 5 }
 0x14f   :  { %v978_v53 = vshll.u32 %v2831_v2, 30  ;;  %v2840_v15 = vsel %vm283_vm2, %v2634_v31, %v284_v6  ;;  %v2843_v39 = vsel %vm1122_vm13, %v2634_v31, %v284_v6  ;;  %v3212_v38 = vand.u32 2147483647, %v2585_v32 }
 0x150   :  { %v682_v13 = vor.u32 4788187, %v681_v1  ;;  %v685_v37 = vcvt.s32.f32 %v678_v14  ;;  %v826_v29 = vsub.s32 32, %v825_v57  ;;  %v828_v19 = vshll.u32 %v3208_v40, %v825_v57  ;;  %v2852_v8 = vpop.eup %2094 }
 0x151   :  { %vm2847_vm4 = vcmp.le.f32.partialorder %v3212_v38, 0.7853982  ;;  %v2854_v48 = vsub.s32 %v975_v45, %v978_v53  ;;  %v831_v43 = vshll.u32 %v3199_v52, %v825_v57  ;;  %v834_v6 = vshll.u32 %v3200_v9, %v825_v57 }
 0x152   :  { %v837_v20 = vshll.u32 %v3201_v54, %v825_v57  ;;  %v683_v11 = vand.u32 2147483647, %v682_v13  ;;  %v827_v47 = vshrl.u32 %v3208_v40, %v826_v29  ;;  %v829_v34 = vshrl.u32 %v3199_v52, %v826_v29 }
 0x153   :  { %v832_v5 = vshrl.u32 %v3200_v9, %v826_v29  ;;  %v981_v36 = vsub.s32 0, %v2854_v48  ;;  %v835_v62 = vshrl.u32 %v3201_v54, %v826_v29  ;;  %v838_v45 = vshrl.u32 %v3202_v18, %v826_v29 }
 0x154   :  { %v840_v28 = vshll.u32 %v3202_v18, %v825_v57  ;;  %v686_v14 = vmul.f32 %v685_v37, %v683_v11  ;;  %v830_v1 = vor.u32 %v829_v34, %v828_v19  ;;  %v841_v38 = vshrl.u32 %v3209_v55, %v826_v29  ;;  %v2867_v13 = vpop.eup %2096 }
 0x155   :  { %v833_v53 = vor.u32 %v832_v5, %v831_v43  ;;  %v1984_v40 = vmin.u32 %v981_v36, %v2854_v48  ;;  %v836_v52 = vor.u32 %v835_v62, %v834_v6  ;;  %v839_v26 = vor.u32 %v838_v45, %v837_v20 }
 0x156   :  { %vm843_vm8 = vcmp.lt.s32.totalorder %v824_v61, 1  ;;  %vm282_vm9 = vcmp.lt.s32.totalorder %v2826_v58, 2  ;;  %v687_v9 = vxor.u32 2147483648, %v686_v14  ;;  %v842_v54 = vor.u32 %v841_v38, %v840_v28 }
 0x157   :  { %vm844_vm10 = vcmp.lt.s32.totalorder %v824_v61, 2  ;;  %vm845_vm7 = vcmp.lt.s32.totalorder %v824_v61, 3  ;;  %vm279_vm13 = vweird.f32 %v2323_v27  ;;  %vm1121_vm2 = vcmp.lt.s32.totalorder %v2820_v56, 2 }
 0x158   :  { %v983_v18 = vclz %v1984_v40  ;;  %vm846_vm11 = vcmp.lt.s32.totalorder %v824_v61, 4  ;;  %v847_v55 = vsel %vm843_vm8, %v827_v47, %v830_v1  ;;  %v851_v57 = vsel %vm843_vm8, %v830_v1, %v833_v53 }
 0x159   :  { %v688_v37 = vsel %vm3185_vm3, %v687_v9, %v686_v14  ;;  %v848_v29 = vsel %vm846_vm11, %v836_v52, 2102212464  ;;  %v852_v19 = vsel %vm846_vm11, %v839_v26, 920167782  ;;  %v855_v43 = vsel %vm843_vm8, %v833_v53, %v836_v52 }
 0x15a   :  { %v691_v6 = vsel %vm2847_vm4, %v2585_v32, %v688_v37  ;;  %v1985_v20 = vadd.s32 4294967294, %v983_v18  ;;  %v849_v11 = vsel %vm845_vm7, %v833_v53, %v848_v29  ;;  %v853_v34 = vsel %vm845_vm7, %v836_v52, %v852_v19 }
 0x15b   :  { %v854_v5 = vsel %vm844_vm10, %v851_v57, %v853_v34  ;;  %v856_v36 = vsel %vm846_vm11, %v842_v54, 1326507024  ;;  %vm286_vm0 = vcmp.eq.s32.totalorder %v2826_v58, 2  ;;  %vm1125_vm12 = vcmp.eq.s32.totalorder %v2820_v56, 2 }
 0x15c   :  { %2098 = vcosq.f32 %v691_v6  ;;  %vm1986_vm3 = vcmp.lt.s32.totalorder %v1985_v20, 0  ;;  %v850_v47 = vsel %vm844_vm10, %v847_v55, %v849_v11  ;;  %v857_v62 = vsel %vm845_vm7, %v839_v26, %v856_v36 }
 0x15d   :  { %v986_v45 = vsel %vm1986_vm3, 0, %v1985_v20  ;;  %v858_v28 = vsel %vm844_vm10, %v855_v43, %v857_v62  ;;  %v2887_v14 = vmul.u32.u64.low %v2833_v51, %v854_v5  ;;  %v2888_v1 = vmul.u32.u64.high %v2833_v51, %v854_v5, %v2887_v14 }
 0x15e   :  { %v987_v53 = vsub.s32 32, %v986_v45  ;;  %v988_v38 = vshll.u32 %v2854_v48, %v986_v45  ;;  %v991_v40 = vsub.s32 4294967266, %v986_v45  ;;  %v3215_v52 = vxor.u32 2147483648, %v2634_v31 }
 0x15f   :  { %v2896_v54 = vmul.u32.u64.low %v2833_v51, %v858_v28  ;;  %v2897_v18 = vmul.u32.u64.high %v2833_v51, %v858_v28, %v2896_v54  ;;  %2100 = vsinq.f32 %v691_v6  ;;  %v869_v19 = vadd.s32 1, %v2888_v1 }
 0x160   :  { %v288_v9 = vsel %vm286_vm0, %v3215_v52, %v2636_v17  ;;  %v3216_v61 = vmov %v3215_v52  ;;  %v989_v57 = vshrl.u32 %v2824_v30, %v987_v53  ;;  %v992_v48 = vadd.s32 127, %v991_v40 }
 0x161   :  { %v289_v26 = vsel %vm282_vm9, %v2840_v15, %v288_v9  ;;  %v1127_v55 = vsel %vm1125_vm12, %v3216_v61, %v2636_v17  ;;  %v481_v31 = vsub.s32 4, %v2410_v44  ;;  %v866_v30 = vmul.u32 %v2833_v51, %v850_v47 }
 0x162   :  { %v2908_v37 = vsel %vm279_vm13, nan, %v289_v26  ;;  %v1128_v29 = vsel %vm1121_vm2, %v2843_v39, %v1127_v55  ;;  %v990_v17 = vor.u32 %v989_v57, %v988_v38  ;;  %v993_v15 = vshll.u32 %v992_v48, 23 }
 0x163   :  { %v1129_v58 = vsel %vm279_vm13, nan, %v1128_v29  ;;  %vm917_vm0 = vcmp.lt.s32.totalorder %v2643_v46, 0  ;;  %vm868_vm12 = vc.u32 %v2897_v18, %v2887_v14  ;;  %v482_v56 = vsel %vm397_vm5, %v481_v31, %v2410_v44 }
 0x164   :  { %v1851_v43 = vmul.f32 %v2450_v35, %v1129_v58  ;;  %vm487_vm11 = vweird.f32 %v2319_v25  ;;  %v492_v27 = vxor.u32 2147483648, %v2613_v10  ;;  %v3217_v39 = vand.u32 2147483647, %v2643_v46 }
 0x165   :  { %v994_v51 = vor.u32 4788187, %v993_v15  ;;  %v870_v20 = vsel %vm868_vm12, %v869_v19, %v2888_v1  ;;  %v484_v11 = vsel %vm2519_vm6, 0, %v482_v56  ;;  %v495_v44 = vxor.u32 2147483648, %v2608_v59 }
 0x166   :  { %vm2929_vm3 = vcmp.le.f32.partialorder %v3217_v39, 0.7853982  ;;  %1867 = vrot.lane.b32.xlu0 %v1851_v43, %s2219_s5  ;;  %v871_v34 = vadd.s32 %v870_v20, %v866_v30  ;;  %v488_v5 = vadd.s32 3, %v484_v11  ;;  %v1326_v36 = vand.u32 3, %v484_v11  ;;  %v2939_v62 = vpop.eup %2098 }
 0x167   :  { %v377_v47 = vsub.s32 4, %v2597_v24  ;;  %v995_v45 = vand.u32 2147483647, %v994_v51  ;;  %v997_v28 = vcvt.s32.f32 %v990_v17  ;;  %v388_v53 = vxor.u32 2147483648, %v2829_v3 }
 0x168   :  { %v391_v1 = vxor.u32 2147483648, %v2774_v22  ;;  %v872_v38 = vadd.s32 536870912, %v871_v34  ;;  %v489_v40 = vand.u32 3, %v488_v5  ;;  %vm1327_vm5 = vcmp.lt.s32.totalorder %v1326_v36, 2 }
 0x169   :  { %vm1328_vm8 = vcmp.eq.s32.totalorder %v1326_v36, 0  ;;  %v998_v7 = vmul.f32 %v997_v28, %v995_v45  ;;  %vm1331_vm6 = vcmp.eq.s32.totalorder %v1326_v36, 2  ;;  %vm3220_vm9 = vcmp.lt.s32.totalorder %v2455_v60, 0  ;;  %v2952_v48 = vpop.eup %2100 }
 0x16a   :  { %v1330_v52 = vsel %vm1328_vm8, %v2608_v59, %v492_v27  ;;  %v378_v9 = vsel %vm3220_vm9, %v377_v47, %v2597_v24  ;;  %v2947_v54 = vshrl.u32 %v872_v38, 30  ;;  %vm490_vm10 = vcmp.lt.s32.totalorder %v489_v40, 2  ;;  %v3222_v38 = vld [vmem:[#allocation13_spill] sm:$0xff] }
 0x16b   :  { %vm491_vm7 = vcmp.eq.s32.totalorder %v489_v40, 0  ;;  %vm494_vm13 = vcmp.eq.s32.totalorder %v489_v40, 2  ;;  %v999_v26 = vxor.u32 2147483648, %v998_v7  ;;  %v1333_v57 = vsel %vm1331_vm6, %v495_v44, %v2613_v10 }
 0x16c   :  { %v493_v61 = vsel %vm491_vm7, %v2608_v59, %v492_v27  ;;  %v496_v55 = vsel %vm494_vm13, %v495_v44, %v2613_v10  ;;  %v874_v29 = vshll.u32 %v2947_v54, 30  ;;  %v1334_v58 = vsel %vm1327_vm5, %v1330_v52, %v1333_v57 }
 0x16d   :  { %v497_v19 = vsel %vm490_vm10, %v493_v61, %v496_v55  ;;  %v380_v24 = vsel %vm2690_vm14, 0, %v378_v9  ;;  %v1000_v31 = vsel %vm917_vm0, %v999_v26, %v998_v7  ;;  %v1335_v10 = vsel %vm487_vm11, nan, %v1334_v58  ;;  %v3223_v7 = vld [vmem:[#allocation17_spill] sm:$0xff] }
 0x16e   :  { %v2962_v59 = vsel %vm487_vm11, nan, %v497_v19  ;;  %v384_v17 = vadd.s32 3, %v380_v24  ;;  %v1003_v15 = vsel %vm2929_vm3, %v2643_v46, %v1000_v31  ;;  %v2969_v30 = vsub.s32 %v871_v34, %v874_v29 }
 0x16f   :  { %v1853_v50 = vmul.f32 %v2448_v33, %v1335_v10  ;;  %v1223_v43 = vand.u32 3, %v380_v24  ;;  %v867_v56 = vadd.s32 %v2887_v14, %v2897_v18  ;;  %vm383_vm14 = vweird.f32 %v2455_v60 }
 0x170   :  { %v385_v27 = vand.u32 3, %v384_v17  ;;  %v585_v39 = vsub.s32 4, %v2497_v12  ;;  %2102 = vcosq.f32 %v1003_v15  ;;  %v877_v25 = vsub.s32 0, %v2969_v30 }
 0x171   :  { %1871 = vrot.lane.b32.xlu0 %v1853_v50, %s2219_s5  ;;  %vm1224_vm2 = vcmp.lt.s32.totalorder %v1223_v43, 2  ;;  %vm1225_vm12 = vcmp.eq.s32.totalorder %v1223_v43, 0  ;;  %vm1228_vm6 = vcmp.eq.s32.totalorder %v1223_v43, 2  ;;  %vm3221_vm9 = vcmp.lt.s32.totalorder %v2336_v42, 0 }
 0x172   :  { %vm386_vm11 = vcmp.lt.s32.totalorder %v385_v27, 2  ;;  %vm387_vm5 = vcmp.eq.s32.totalorder %v385_v27, 0  ;;  %vm390_vm8 = vcmp.eq.s32.totalorder %v385_v27, 2  ;;  %v1227_v51 = vsel %vm1225_vm12, %v2774_v22, %v388_v53 }
 0x173   :  { %v1980_v20 = vmin.u32 %v877_v25, %v2969_v30  ;;  %v389_v14 = vsel %vm387_vm5, %v2774_v22, %v388_v53  ;;  %v392_v18 = vsel %vm390_vm8, %v391_v1, %v2829_v3  ;;  %v1230_v44 = vsel %vm1228_vm6, %v391_v1, %v2829_v3 }
 0x174   :  { %v393_v11 = vsel %vm386_vm11, %v389_v14, %v392_v18  ;;  %v586_v34 = vsel %vm3221_vm9, %v585_v39, %v2497_v12  ;;  %v596_v5 = vxor.u32 2147483648, %v2759_v0  ;;  %v1231_v45 = vsel %vm1224_vm2, %v1227_v51, %v1230_v44 }
 0x175   :  { %v879_v36 = vclz %v1980_v20  ;;  %v2989_v47 = vsel %vm383_vm14, nan, %v393_v11  ;;  %v588_v22 = vsel %vm2617_vm1, 0, %v586_v34  ;;  %v1232_v28 = vsel %vm383_vm14, nan, %v1231_v45  ;;  %v3229_v11 = vld [vmem:[#allocation16_spill] sm:$0xff] }
 0x176   :  { %v592_v3 = vadd.s32 3, %v588_v22  ;;  %v599_v53 = vxor.u32 2147483648, %v2698_v4  ;;  %v1429_v1 = vand.u32 3, %v588_v22  ;;  %v1852_v40 = vmul.f32 %v3222_v38, %v1232_v28 }
 0x177   :  { %v1981_v12 = vadd.s32 4294967294, %v879_v36  ;;  %vm591_vm10 = vweird.f32 %v2336_v42  ;;  %v689_v52 = vsub.s32 4, %v3223_v7  ;;  %2104 = vsinq.f32 %v1003_v15 }
 0x178   :  { %v593_v9 = vand.u32 3, %v592_v3  ;;  %vm1431_vm7 = vcmp.eq.s32.totalorder %v1429_v1, 0  ;;  %vm1434_vm13 = vcmp.eq.s32.totalorder %v1429_v1, 2  ;;  %1869 = vrot.lane.b32.xlu1 %v1852_v40, %s2219_s5  ;;  %vm3224_vm1 = vcmp.lt.s32.totalorder %v2585_v32, 0 }
 0x179   :  { %vm1982_vm2 = vcmp.lt.s32.totalorder %v1981_v12, 0  ;;  %v1433_v60 = vsel %vm1431_vm7, %v2698_v4, %v596_v5  ;;  %v1436_v23 = vsel %vm1434_vm13, %v599_v53, %v2759_v0  ;;  %v690_v26 = vsel %vm3224_vm1, %v689_v52, %v3223_v7 }
 0x17a   :  { %v882_v61 = vsel %vm1982_vm2, 0, %v1981_v12  ;;  %vm594_vm14 = vcmp.lt.s32.totalorder %v593_v9, 2  ;;  %vm595_vm12 = vcmp.eq.s32.totalorder %v593_v9, 0  ;;  %vm1430_vm11 = vcmp.lt.s32.totalorder %v1429_v1, 2  ;;  %v3006_v55 = vpop.eup %2102 }
 0x17b   :  { %v883_v57 = vsub.s32 32, %v882_v61  ;;  %v887_v29 = vsub.s32 4294967266, %v882_v61  ;;  %v597_v19 = vsel %vm595_vm12, %v2698_v4, %v596_v5  ;;  %vm598_vm5 = vcmp.eq.s32.totalorder %v593_v9, 2 }
 0x17c   :  { %v884_v58 = vshll.u32 %v2969_v30, %v882_v61  ;;  %v600_v24 = vsel %vm598_vm5, %v599_v53, %v2759_v0  ;;  %v1437_v31 = vsel %vm1430_vm11, %v1433_v60, %v1436_v23  ;;  %v692_v10 = vsel %vm2847_vm4, 0, %v690_v26 }
 0x17d   :  { %vm695_vm8 = vweird.f32 %v2585_v32  ;;  %vm813_vm6 = vcmp.lt.s32.totalorder %v2746_v49, 0  ;;  %v885_v17 = vshrl.u32 %v867_v56, %v883_v57  ;;  %v888_v15 = vadd.s32 127, %v887_v29  ;;  %v3231_v29 = vld [vmem:[#allocation15_spill] sm:$0xff] }
 0x17e   :  { %v601_v50 = vsel %vm594_vm14, %v597_v19, %v600_v24  ;;  %v1438_v4 = vsel %vm591_vm10, nan, %v1437_v31  ;;  %v3225_v43 = vand.u32 2147483647, %v2746_v49  ;;  %v696_v39 = vadd.s32 3, %v692_v10 }
 0x17f   :  { %v3026_v0 = vsel %vm591_vm10, nan, %v601_v50  ;;  %v1854_v27 = vmul.f32 %v3228_v21, %v1438_v4  ;;  %v700_v56 = vxor.u32 2147483648, %v2952_v48  ;;  %v886_v25 = vor.u32 %v885_v17, %v884_v58 }
 0x180   :  { %vm3020_vm9 = vcmp.le.f32.partialorder %v3225_v43, 0.7853982  ;;  %v889_v51 = vshll.u32 %v888_v15, 23  ;;  %v703_v20 = vxor.u32 2147483648, %v2939_v62  ;;  %v1532_v14 = vand.u32 3, %v692_v10 }
 0x181   :  { %1873 = vrot.lane.b32.xlu1 %v1854_v27, %s2219_s5  ;;  %v697_v18 = vand.u32 3, %v696_v39  ;;  %v793_v44 = vsub.s32 4, %v3229_v11  ;;  %v804_v34 = vxor.u32 2147483648, %v2867_v13  ;;  %v807_v42 = vxor.u32 2147483648, %v2852_v8  ;;  %v3035_v45 = vpop.eup %2104  ;;  %v3232_v39 = vld [vmem:[#allocation14_spill] sm:$0xff] }
 0x182   :  { %v890_v5 = vor.u32 4788187, %v889_v51  ;;  %v893_v36 = vcvt.s32.f32 %v886_v25  ;;  %vm1533_vm4 = vcmp.lt.s32.totalorder %v1532_v14, 2  ;;  %vm1534_vm10 = vcmp.eq.s32.totalorder %v1532_v14, 0 }
 0x183   :  { %vm698_vm7 = vcmp.lt.s32.totalorder %v697_v18, 2  ;;  %vm699_vm13 = vcmp.eq.s32.totalorder %v697_v18, 0  ;;  %vm702_vm2 = vcmp.eq.s32.totalorder %v697_v18, 2  ;;  %v1536_v22 = vsel %vm1534_vm10, %v2939_v62, %v700_v56 }
 0x184   :  { %v891_v28 = vand.u32 2147483647, %v890_v5  ;;  %v701_v3 = vsel %vm699_vm13, %v2939_v62, %v700_v56  ;;  %v704_v53 = vsel %vm702_vm2, %v703_v20, %v2952_v48  ;;  %vm1537_vm1 = vcmp.eq.s32.totalorder %v1532_v14, 2 }
 0x185   :  { %v705_v1 = vsel %vm698_vm7, %v701_v3, %v704_v53  ;;  %v1539_v12 = vsel %vm1537_vm1, %v703_v20, %v2952_v48  ;;  %vm3230_vm14 = vcmp.lt.s32.totalorder %v2504_v41, 0  ;;  %v897_v7 = vsub.s32 4, %v2947_v54 }
 0x186   :  { %v794_v40 = vsel %vm3230_vm14, %v793_v44, %v3229_v11  ;;  %v894_v52 = vmul.f32 %v893_v36, %v891_v28  ;;  %v706_v9 = vsel %vm695_vm8, nan, %v705_v1  ;;  %v1540_v60 = vsel %vm1533_vm4, %v1536_v22, %v1539_v12  ;;  %v3233_v28 = vld [vmem:[#allocation18_spill] sm:$0xff] }
 0x187   :  { %v796_v62 = vsel %vm2769_vm15, 0, %v794_v40  ;;  %v1541_v23 = vsel %vm695_vm8, nan, %v1540_v60  ;;  %v898_v61 = vsel %vm813_vm6, %v897_v7, %v2947_v54  ;;  %vm799_vm12 = vweird.f32 %v2504_v41 }
 0x188   :  { %v800_v26 = vadd.s32 3, %v796_v62  ;;  %v1635_v48 = vand.u32 3, %v796_v62  ;;  %v895_v57 = vxor.u32 2147483648, %v894_v52  ;;  %v1855_v19 = vmul.f32 %v3231_v29, %v1541_v23 }
 0x189   :  { %v900_v58 = vsel %vm3020_vm9, 0, %v898_v61  ;;  %v1001_v25 = vsub.s32 4, %v2831_v2  ;;  %v1012_v41 = vxor.u32 2147483648, %v3035_v45  ;;  %v1015_v20 = vxor.u32 2147483648, %v3006_v55  ;;  %v1916_v61 = vld [vmem:[#allocation7] sm:$0xff] }
 0x18a   :  { %v801_v24 = vand.u32 3, %v800_v26  ;;  %vm1636_vm11 = vcmp.lt.s32.totalorder %v1635_v48, 2  ;;  %vm1637_vm15 = vcmp.eq.s32.totalorder %v1635_v48, 0  ;;  %vm1640_vm5 = vcmp.eq.s32.totalorder %v1635_v48, 2  ;;  %1875 = vrot.lane.b32.xlu0 %v1855_v19, %s2219_s5 }
 0x18b   :  { %v896_v32 = vsel %vm813_vm6, %v895_v57, %v894_v52  ;;  %v1639_v16 = vsel %vm1637_vm15, %v2852_v8, %v804_v34  ;;  %v1642_v54 = vsel %vm1640_vm5, %v807_v42, %v2867_v13  ;;  %v904_v31 = vadd.s32 3, %v900_v58 }
 0x18c   :  { %v899_v10 = vsel %vm3020_vm9, %v2746_v49, %v896_v32  ;;  %vm802_vm8 = vcmp.lt.s32.totalorder %v801_v24, 2  ;;  %vm803_vm4 = vcmp.eq.s32.totalorder %v801_v24, 0  ;;  %vm806_vm10 = vcmp.eq.s32.totalorder %v801_v24, 2 }
 0x18d   :  { %2106 = vcosq.f32 %v899_v10  ;;  %v805_v17 = vsel %vm803_vm4, %v2852_v8, %v804_v34  ;;  %v808_v15 = vsel %vm806_vm10, %v807_v42, %v2867_v13  ;;  %v1643_v50 = vsel %vm1636_vm11, %v1639_v16, %v1642_v54  ;;  %v1901_v54 = vld [vmem:[#allocation2 + $0x8] sm:$0xff] }
 0x18e   :  { %2108 = vsinq.f32 %v899_v10  ;;  %v809_v4 = vsel %vm802_vm8, %v805_v17, %v808_v15  ;;  %v1644_v43 = vsel %vm799_vm12, nan, %v1643_v50  ;;  %v905_v56 = vand.u32 3, %v904_v31  ;;  %v1903_v50 = vld [vmem:[#allocation2 + $0x18] sm:$0xff] }
 0x18f   :  { %v810_v27 = vsel %vm799_vm12, nan, %v809_v4  ;;  %v1856_v30 = vmul.f32 %v3232_v39, %v1644_v43  ;;  %2110 = vpow2.f32 %v2813_v63  ;;  %v1738_v8 = vand.u32 3, %v900_v58 }
 0x190   :  { %v1002_v13 = vsel %vm917_vm0, %v1001_v25, %v2831_v2  ;;  %v1019_v14 = vmul.f32 %v2450_v35, %v2908_v37  ;;  %vm906_vm6 = vcmp.lt.s32.totalorder %v905_v56, 2  ;;  %vm907_vm9 = vcmp.eq.s32.totalorder %v905_v56, 0 }
 0x191   :  { %1877 = vrot.lane.b32.xlu1 %v1856_v30, %s2219_s5  ;;  %v1004_v51 = vsel %vm2929_vm3, 0, %v1002_v13  ;;  %vm910_vm7 = vcmp.eq.s32.totalorder %v905_v56, 2  ;;  %v1020_v11 = vmul.f32 %v3222_v38, %v2989_v47  ;;  %v1021_v2 = vmul.f32 %v2448_v33, %v2962_v59  ;;  %v1904_v30 = vld [vmem:[#allocation2 + $0x20] sm:$0xff] }
 0x192   :  { %v1008_v63 = vadd.s32 3, %v1004_v51  ;;  %v1841_v18 = vand.u32 3, %v1004_v51  ;;  %v3092_v6 = vmul.f32 %v3228_v21, %v3026_v0  ;;  %v3095_v44 = vmul.f32 %v3231_v29, %v706_v9  ;;  %v1905_v51 = vld [vmem:[#allocation2 + $0x28] sm:$0xff] }
 0x193   :  { %vm1007_vm0 = vweird.f32 %v2643_v46  ;;  %v3101_v38 = vmul.f32 %v3232_v39, %v810_v27  ;;  %vm1743_vm11 = vcmp.eq.s32.totalorder %v1738_v8, 2  ;;  %vm1740_vm15 = vcmp.eq.s32.totalorder %v1738_v8, 0  ;;  %v1900_v46 = vld [vmem:[#allocation2] sm:$0xff] }
 0x194   :  { %v1009_v35 = vand.u32 3, %v1008_v63  ;;  %vm1843_vm3 = vcmp.eq.s32.totalorder %v1841_v18, 0  ;;  %vm1846_vm13 = vcmp.eq.s32.totalorder %v1841_v18, 2  ;;  %vm1842_vm2 = vcmp.lt.s32.totalorder %v1841_v18, 2  ;;  %v1907_v18 = vld [vmem:[#allocation2 + $0x38] sm:$0xff] }
 0x195   :  { %v1845_v37 = vsel %vm1843_vm3, %v3006_v55, %v1012_v41  ;;  %v1848_v47 = vsel %vm1846_vm13, %v1015_v20, %v3035_v45  ;;  %vm1739_vm5 = vcmp.lt.s32.totalorder %v1738_v8, 2  ;;  %vm903_vm8 = vweird.f32 %v2746_v49  ;;  %v1902_v49 = vld [vmem:[#allocation2 + $0x10] sm:$0xff] }
 0x196   :  { %vm1010_vm1 = vcmp.lt.s32.totalorder %v1009_v35, 2  ;;  %vm1011_vm14 = vcmp.eq.s32.totalorder %v1009_v35, 0  ;;  %vm1014_vm12 = vcmp.eq.s32.totalorder %v1009_v35, 2  ;;  %v1849_v59 = vsel %vm1842_vm2, %v1845_v37, %v1848_v47  ;;  %v1906_v35 = vld [vmem:[#allocation2 + $0x30] sm:$0xff] }
 0x197   :  { %v2107_v33 = vpop.eup %2106  ;;  %v1013_v34 = vsel %vm1011_vm14, %v3006_v55, %v1012_v41  ;;  %v1016_v42 = vsel %vm1014_vm12, %v1015_v20, %v3035_v45  ;;  %v1850_v5 = vsel %vm1007_vm0, nan, %v1849_v59  ;;  %vm1891_vm4 = vcmask 130048  }
 0x198   :  { %v2109_v0 = vpop.eup %2108  ;;  %v911_v21 = vxor.u32 2147483648, %v2107_v33  ;;  %v1017_v22 = vsel %vm1010_vm1, %v1013_v34, %v1016_v42  ;;  %v1858_v3 = vmul.f32 %v3233_v28, %v1850_v5  ;;  %vm1925_vm10 = vcmask 261120  }
 0x199   :  { %v908_v36 = vxor.u32 2147483648, %v2109_v0  ;;  %v1018_v12 = vsel %vm1007_vm0, nan, %v1017_v22  ;;  %v2111_v40 = vpop.eup %2110 }
 0x19a   :  { %v912_v53 = vsel %vm910_vm7, %v911_v21, %v2109_v0  ;;  %v1745_v1 = vsel %vm1743_vm11, %v911_v21, %v2109_v0  ;;  %1881 = vrot.lane.b32.xlu1 %v1858_v3, %s2219_s5  ;;  %v1026_v7 = vmul.f32 %v3233_v28, %v1018_v12 }
 0x19b   :  { %v909_v55 = vsel %vm907_vm9, %v2107_v33, %v908_v36  ;;  %v1742_v45 = vsel %vm1740_vm15, %v2107_v33, %v908_v36 }
 0x19c   :  { %v913_v52 = vsel %vm906_vm6, %v909_v55, %v912_v53  ;;  %v1746_v9 = vsel %vm1739_vm5, %v1742_v45, %v1745_v1 }
 0x19d   :  { %v914_v60 = vsel %vm903_vm8, nan, %v913_v52  ;;  %v1747_v62 = vsel %vm903_vm8, nan, %v1746_v9 }
 0x19e   :  { %v1857_v23 = vmul.f32 %v2111_v40, %v1747_v62  ;;  %v1025_v26 = vmul.f32 %v2111_v40, %v914_v60 }
 0x1a0   :  { %1879 = vrot.lane.b32.xlu0 %v1857_v23, %s2219_s5 }
 0x1d8   :  { %v1868_v48 = vpop.permute.xlu0 %1867 }
 0x1d9   :  { %v1892_v57 = vsel %vm1891_vm4, %v1019_v14, %v1868_v48 }
 0x1da   :  { %v1908_v29 = vadd.f32 %v1900_v46, %v1892_v57 }
 0x1dc   :  { %v1917_v19 = vadd.f32 %v1916_v61, %v1908_v29 }
 0x1de   :  { %1926 = vst.msk [vmem:[#allocation8] sm:$0xff] %vm1925_vm10, %v1917_v19 }
 0x1e3   :  { %v1872_v58 = vpop.permute.xlu0 %1871 }
 0x1e4   :  { %v1894_v24 = vsel %vm1891_vm4, %v1021_v2, %v1872_v58 }
 0x1e5   :  { %v1910_v32 = vadd.f32 %v1902_v49, %v1894_v24 }
 0x1e7   :  { %v1919_v16 = vadd.f32 %v1916_v61, %v1910_v32 }
 0x1e9   :  { %1928 = vst.msk [vmem:[#allocation8 + $0x10] sm:$0xff] %vm1925_vm10, %v1919_v16 }
 0x1ea   :  { %v1870_v31 = vpop.permute.xlu1 %1869 }
 0x1eb   :  { %v1893_v10 = vsel %vm1891_vm4, %v1020_v11, %v1870_v31 }
 0x1ec   :  { %v1909_v17 = vadd.f32 %v1901_v54, %v1893_v10 }
 0x1ee   :  { %v1918_v15 = vadd.f32 %v1916_v61, %v1909_v17 }
 0x1f0   :  { %1927 = vst.msk [vmem:[#allocation8 + $0x8] sm:$0xff] %vm1925_vm10, %v1918_v15 }
 0x1f3   :  { %v1874_v4 = vpop.permute.xlu1 %1873 }
 0x1f4   :  { %v1895_v43 = vsel %vm1891_vm4, %v3092_v6, %v1874_v4 }
 0x1f5   :  { %v1911_v27 = vadd.f32 %v1903_v50, %v1895_v43 }
 0x1f7   :  { %v1920_v39 = vadd.f32 %v1916_v61, %v1911_v27 }
 0x1f9   :  { %1929 = vst.msk [vmem:[#allocation8 + $0x18] sm:$0xff] %vm1925_vm10, %v1920_v39 }
 0x1fc   :  { %v1876_v56 = vpop.permute.xlu0 %1875 }
 0x1fd   :  { %v1896_v25 = vsel %vm1891_vm4, %v3095_v44, %v1876_v56 }
 0x1fe   :  { %v1912_v8 = vadd.f32 %v1904_v30, %v1896_v25 }
 0x200   :  { %v1921_v13 = vadd.f32 %v1916_v61, %v1912_v8 }
 0x202   :  { %1930 = vst.msk [vmem:[#allocation8 + $0x20] sm:$0xff] %vm1925_vm10, %v1921_v13 }
 0x203   :  { %v1878_v41 = vpop.permute.xlu1 %1877 }
 0x204   :  { %v1897_v20 = vsel %vm1891_vm4, %v3101_v38, %v1878_v41 }
 0x205   :  { %v1913_v14 = vadd.f32 %v1905_v51, %v1897_v20 }
 0x207   :  { %v1922_v63 = vadd.f32 %v1916_v61, %v1913_v14 }
 0x209   :  { %1931 = vst.msk [vmem:[#allocation8 + $0x28] sm:$0xff] %vm1925_vm10, %v1922_v63 }
 0x20c   :  { %v1882_v11 = vpop.permute.xlu1 %1881 }
 0x20d   :  { %v1899_v2 = vsel %vm1891_vm4, %v1026_v7, %v1882_v11 }
 0x20e   :  { %v1915_v6 = vadd.f32 %v1907_v18, %v1899_v2 }
 0x210   :  { %v1924_v44 = vadd.f32 %v1916_v61, %v1915_v6 }
 0x212   :  { %v1880_v37 = vpop.permute.xlu0 %1879  ;;  %1933 = vst.msk [vmem:[#allocation8 + $0x38] sm:$0xff] %vm1925_vm10, %v1924_v44 }
 0x213   :  { %v1898_v47 = vsel %vm1891_vm4, %v1025_v26, %v1880_v37 }
 0x214   :  { %v1914_v33 = vadd.f32 %v1906_v35, %v1898_v47 }
 0x216   :  { %v1923_v38 = vadd.f32 %v1916_v61, %v1914_v33 }
 0x218   :  { %1932 = vst.msk [vmem:[#allocation8 + $0x30] sm:$0xff] %vm1925_vm10, %v1923_v38 }
 0x219   :  { %2191 = shalt.err (!%p2188_p0)
}
 0x21a   :  { %s2192_s22 = scalar_lea.hbm %s3157_s6, 1024 }
 0x21b   :  { %p2193_p1 = scmp.ne.s32.totalorder %s3157_s6, %s2192_s22  ;;  %p2196_p2 = scmp.lt.u32.totalorder %s2192_s22, %s3157_s6 }
 0x21d   :  { %p2198_p3 = pnand %p2196_p2, %p2193_p1 }
 0x21f   :  { %2201 = shalt.err (!%p2198_p3)
}
 0x220   :  { %1945 = dma.vmem_to_hbm [thread:$0]  %s1940_s17, 1024, %s3157_s6, [#allocation4], %s2210_s1, %s2210_s1, %s2211_s19  }
 0x221   :  { %2206 = dma.done.wait [#allocation4], 1024  }
 0x222   :  { %2207 = vsyncadd [#allocation4], 4294966272 }
 0x223   :  { %1949 = vsyncpa [#allocation3], 1 }
 0x224   :  { %1950 = vsyncpa [#allocation6], 1 }
 0x225   :  { %1951 = vsyncpa [#allocation4], 1 }

</bundles_post_ra>
